<compile_context>
chip_gen: v7x
topology: tpu7x:2x2x1
jax: 0.10.0
libtpu: 0.0.40
codegen_flags: <defaults>
</compile_context>

<pallas_src>
import jax
import jax.numpy as jnp
import numpy as np
from jax.experimental import pallas as pl
from jax.experimental.pallas import tpu as pltpu

EPS = 1e-5

# conv-transpose (k=4, s=2, p=1) phase taps: output row 2r+a reads input row
# r+dy with kernel row ky, for (ky, dy) in _TAPS[a]; same table for columns.
_TAPS = {0: ((1, 0), (3, -1)), 1: ((0, 1), (2, 0))}


def _make_kernel(H, W):
    HW = H * W

    def kernel(x_ref, code_ref, edge_ref, w1_ref, b1_ref, w2_ref, b2_ref,
               w3_ref, b3_ref, wr_ref, br_ref, out_ref):
        xf = x_ref[0]                                    # (Cin, HW)  lane-dense
        code = code_ref[0].astype(jnp.int32)             # (Cout, HW) parity code
        b2 = b2_ref[...]                                 # (P, 1)
        b3 = b3_ref[...]                                 # (Cout, 1)
        w3 = w3_ref[...]                                 # (Cout, P)

        # --- stage 1: 1x1 conv + BN + ReLU (BN folded into w1/b1) -----------
        h = jnp.maximum(
            jnp.dot(w1_ref[...], xf, preferred_element_type=jnp.float32)
            + b1_ref[...], 0.0)                          # (P, HW)

        # --- residual branch: 1x1 conv (bias, no BN / act) ------------------
        res = (jnp.dot(wr_ref[...], xf, preferred_element_type=jnp.float32)
               + br_ref[...])                            # (Cout, HW)

        # --- shifted + edge-masked taps of h (hoisted out of the phase loop).
        # slab(dy,dx)[:, r*W+c] = h[:, (r+dy)*W + (c+dx)], 0 outside the image.
        # The shift is a lane roll; every wrapped lane is exactly an
        # out-of-image position, which the precomputed edge mask zeroes.
        slabs = {}
        for dy in (-1, 0, 1):
            for dx in (-1, 0, 1):
                delta = dy * W + dx
                sh = h if delta == 0 else pltpu.roll(h, (-delta) % HW, axis=1)
                slabs[(dy, dx)] = sh * edge_ref[dy + 1, dx + 1]

        # --- stages 2+3 per output parity phase (a, b) -----------------------
        # TODO(synk): cast stage-2/3 matmul operands to bf16 (f32 accumulate)
        #             for v6e/v7x MXU peak once a looser tolerance is signed
        #             off; at these channel widths the kernel is store/layout
        #             bound, not MXU-bound, so f32 parity is kept here.
        for a in (0, 1):
            for b in (0, 1):
                # conv-transpose phase (a,b): 4 partial dots accumulated
                # (split-K; BN2 folded into w2/b2).
                acc = None
                for ky, dy in _TAPS[a]:
                    for kx, dx in _TAPS[b]:
                        part = jnp.dot(w2_ref[ky, kx], slabs[(dy, dx)],
                                       preferred_element_type=jnp.float32)
                        acc = part if acc is None else acc + part
                g = jnp.maximum(acc + b2, 0.0)            # (P, HW)
                # stage 3: 1x1 conv + BN (no act), BN3 folded into w3/b3
                o = jnp.dot(w3, g, preferred_element_type=jnp.float32) + b3
                # MaxUnpool2d(2,2) phase of the residual: parity-code match
                up = jnp.where(code == (2 * a + b), res, 0.0)
                # dense (Cout, HW) store: HW >= 128 lanes
                out_ref[0, a, b] = jnp.maximum(o + up, 0.0)

    return kernel


def bottleneck_up_forward(x_nchw, mp_indices_nchw, params):
    """Pallas implementation of BottleneckUp.forward (inference-mode BN)."""
    x_nchw = x_nchw.astype(jnp.float32)
    N, Cin, H, W = x_nchw.shape
    HW = H * W
    x = x_nchw.reshape(N, Cin, HW)                       # NCHW kept, no transpose

    # 2-bit parity code (2*a + b) of the stored max-pool index, shipped as int8
    # (4x smaller DMA).  Valid because mp_indices come from MaxPool2d(2,2).
    idx = mp_indices_nchw.astype(jnp.int32)
    Cout = idx.shape[1]
    code = ((idx // (2 * W)) % 2) * 2 + (idx % 2)
    code = code.astype(jnp.int8).reshape(N, Cout, HW)

    # edge-validity masks for the 9 (dy, dx) shifts of the conv-transpose taps,
    # computed once on the host: (3, 3, 1, H*W) f32 of 0/1.
    r = jnp.arange(H, dtype=jnp.int32)[:, None]
    c = jnp.arange(W, dtype=jnp.int32)[None, :]
    edge = jnp.stack([
        jnp.stack([
            ((r + dy >= 0) & (r + dy < H) & (c + dx >= 0) & (c + dx < W))
            .astype(jnp.float32).reshape(1, HW)
            for dx in (-1, 0, 1)], axis=0)
        for dy in (-1, 0, 1)], axis=0)                   # (3, 3, 1, HW)

    def bn_fold(g, b, m, v):
        s = g / jnp.sqrt(v + EPS)
        return s, b - m * s

    # stage 1: Conv2d(Cin, P, 1) + BN1 -> (P, Cin) weight, (P, 1) bias
    s1, t1 = bn_fold(params['bn1_g'], params['bn1_b'], params['bn1_m'], params['bn1_v'])
    w1 = params['conv1_w'][:, :, 0, 0] * s1[:, None]
    b1 = (params['conv1_b'] * s1 + t1)[:, None]
    # stage 2: ConvTranspose2d(P, P, 4, stride=2, pad=1) + BN2
    #   convt_w is (ci, co, ky, kx) -> w2[ky, kx] = (co, ci) with BN2 folded in
    s2, t2 = bn_fold(params['bn2_g'], params['bn2_b'], params['bn2_m'], params['bn2_v'])
    w2 = jnp.transpose(params['convt_w'], (2, 3, 1, 0)) * s2[None, None, :, None]
    b2 = (params['convt_b'] * s2 + t2)[:, None]
    # stage 3: Conv2d(P, Cout, 1) + BN3 -> (Cout, P)
    s3, t3 = bn_fold(params['bn3_g'], params['bn3_b'], params['bn3_m'], params['bn3_v'])
    w3 = params['conv3_w'][:, :, 0, 0] * s3[:, None]
    b3 = (params['conv3_b'] * s3 + t3)[:, None]
    # residual: Conv2d(Cin, Cout, 1) -> (Cout, Cin)
    wr = params['conv2_w'][:, :, 0, 0]
    br = params['conv2_b'][:, None]

    P = w1.shape[0]
    full = lambda rank: (lambda n: (0,) * rank)

    # TODO(synk): for large H*W add a row-tile grid axis (1-row halo on h,
    #             W-aligned lane slices of the output) so per-step blocks fit
    #             v7x's 64 MiB VMEM and megacore gets work when N == 1; raise
    #             pipeline_mode=pl.Buffered(3) on x/code once tiled.
    grid_spec = pltpu.PrefetchScalarGridSpec(
        num_scalar_prefetch=0,
        grid=(N,),
        in_specs=[
            pl.BlockSpec((1, Cin, HW), lambda n: (n, 0, 0)),
            pl.BlockSpec((1, Cout, HW), lambda n: (n, 0, 0)),
            pl.BlockSpec((3, 3, 1, HW), full(4)),
            pl.BlockSpec((P, Cin), full(2)),
            pl.BlockSpec((P, 1), full(2)),
            pl.BlockSpec((4, 4, P, P), full(4)),
            pl.BlockSpec((P, 1), full(2)),
            pl.BlockSpec((Cout, P), full(2)),
            pl.BlockSpec((Cout, 1), full(2)),
            pl.BlockSpec((Cout, Cin), full(2)),
            pl.BlockSpec((Cout, 1), full(2)),
        ],
        out_specs=pl.BlockSpec((1, 2, 2, Cout, HW), lambda n: (n, 0, 0, 0, 0)),
    )
    phases = pl.pallas_call(
        _make_kernel(H, W),
        out_shape=jax.ShapeDtypeStruct((N, 2, 2, Cout, HW), jnp.float32),
        grid_spec=grid_spec,
        compiler_params=pltpu.CompilerParams(
            dimension_semantics=("parallel",),
            vmem_limit_bytes=32 * 1024 * 1024),
    )(x, code, edge, w1, b1, w2, b2, w3, b3, wr, br)

    # phases[n, a, b, co, r*W + c] == out[n, co, 2r + a, 2c + b]
    ph = phases.reshape(N, 2, 2, Cout, H, W)
    return jnp.transpose(ph, (0, 3, 4, 1, 5, 2)).reshape(N, Cout, 2 * H, 2 * W)


def reference_forward(x, idx, p):
    """Pure-JAX (lax) reference reproducing the PyTorch forward, NCHW."""
    def bn(y, g, b, m, v):
        return ((y - m[None, :, None, None]) / jnp.sqrt(v[None, :, None, None] + EPS)
                * g[None, :, None, None] + b[None, :, None, None])

    def conv1x1(y, w4, b):
        out = jax.lax.conv_general_dilated(
            y, w4, (1, 1), 'VALID', dimension_numbers=('NCHW', 'OIHW', 'NCHW'))
        return out + b[None, :, None, None]

    h = jax.nn.relu(bn(conv1x1(x, p['conv1_w'], p['conv1_b']),
                       p['bn1_g'], p['bn1_b'], p['bn1_m'], p['bn1_v']))
    wct = jnp.transpose(p['convt_w'], (1, 0, 2, 3))[:, :, ::-1, ::-1]
    ct = jax.lax.conv_general_dilated(
        h, wct, (1, 1), [(2, 2), (2, 2)], lhs_dilation=(2, 2),
        dimension_numbers=('NCHW', 'OIHW', 'NCHW')) + p['convt_b'][None, :, None, None]
    h2 = jax.nn.relu(bn(ct, p['bn2_g'], p['bn2_b'], p['bn2_m'], p['bn2_v']))
    out = bn(conv1x1(h2, p['conv3_w'], p['conv3_b']),
             p['bn3_g'], p['bn3_b'], p['bn3_m'], p['bn3_v'])

    res = conv1x1(x, p['conv2_w'], p['conv2_b'])
    N, C, H, W = res.shape
    up = jnp.zeros((N, C, 4 * H * W), jnp.float32)
    ni = jnp.arange(N)[:, None, None]
    ci = jnp.arange(C)[None, :, None]
    up = up.at[ni, ci, idx.reshape(N, C, H * W)].set(res.reshape(N, C, H * W))
    up = up.reshape(N, C, 2 * H, 2 * W)
    return jax.nn.relu(out + up)


def init_params(key, inplanes, planes, outplanes):
    ks = jax.random.split(key, 20)
    nrm = lambda k, shape, s=0.1: s * jax.random.normal(k, shape, jnp.float32)
    p = {
        'conv1_w': nrm(ks[0], (planes, inplanes, 1, 1)),
        'conv1_b': nrm(ks[1], (planes,)),
        'bn1_g': 1.0 + nrm(ks[2], (planes,)),
        'bn1_b': nrm(ks[3], (planes,)),
        'bn1_m': nrm(ks[4], (planes,)),
        'bn1_v': 0.5 + jnp.abs(nrm(ks[5], (planes,))),
        'convt_w': nrm(ks[6], (planes, planes, 4, 4)),
        'convt_b': nrm(ks[7], (planes,)),
        'bn2_g': 1.0 + nrm(ks[8], (planes,)),
        'bn2_b': nrm(ks[9], (planes,)),
        'bn2_m': nrm(ks[10], (planes,)),
        'bn2_v': 0.5 + jnp.abs(nrm(ks[11], (planes,))),
        'conv3_w': nrm(ks[12], (outplanes, planes, 1, 1)),
        'conv3_b': nrm(ks[13], (outplanes,)),
        'bn3_g': 1.0 + nrm(ks[14], (outplanes,)),
        'bn3_b': nrm(ks[15], (outplanes,)),
        'bn3_m': nrm(ks[16], (outplanes,)),
        'bn3_v': 0.5 + jnp.abs(nrm(ks[17], (outplanes,))),
        'conv2_w': nrm(ks[18], (outplanes, inplanes, 1, 1)),
        'conv2_b': nrm(ks[19], (outplanes,)),
    }
    return p


if __name__ == "__main__":
    key = jax.random.PRNGKey(0)
    kx, kp, ka, kb = jax.random.split(key, 4)
    N, inplanes, planes, outplanes, H, W = 2, 4, 16, 8, 16, 16

    x = jax.random.normal(kx, (N, inplanes, H, W), jnp.float32)
    # mp_indices as produced by MaxPool2d(2, stride=2, return_indices=True):
    # flat index (within the 2H x 2W plane) of the max inside each 2x2 window.
    a = jax.random.randint(ka, (N, outplanes, H, W), 0, 2)
    b = jax.random.randint(kb, (N, outplanes, H, W), 0, 2)
    m = jnp.arange(H)[None, None, :, None]
    l = jnp.arange(W)[None, None, None, :]
    mp_indices = ((2 * m + a) * (2 * W) + (2 * l + b)).astype(jnp.int32)

    params = init_params(kp, inplanes, planes, outplanes)

    out = jax.block_until_ready(bottleneck_up_forward(x, mp_indices, params))
    ref = jax.block_until_ready(reference_forward(x, mp_indices, params))
    np.testing.assert_allclose(np.asarray(out), np.asarray(ref), rtol=1e-4, atol=1e-4)
    print("KERNEL_OK")
</pallas_src>

<mosaic_0001>
module attributes {stable_mosaic.version = 11 : i64} {
  func.func @kernel(%arg0: i32, %arg1: memref<1x4x256xf32, #tpu.memory_space<vmem>>, %arg2: memref<1x8x256xi8, #tpu.memory_space<vmem>>, %arg3: memref<3x3x1x256xf32, #tpu.memory_space<vmem>>, %arg4: memref<16x4xf32, #tpu.memory_space<vmem>>, %arg5: memref<16x1xf32, #tpu.memory_space<vmem>>, %arg6: memref<4x4x16x16xf32, #tpu.memory_space<vmem>>, %arg7: memref<16x1xf32, #tpu.memory_space<vmem>>, %arg8: memref<8x16xf32, #tpu.memory_space<vmem>>, %arg9: memref<8x1xf32, #tpu.memory_space<vmem>>, %arg10: memref<8x4xf32, #tpu.memory_space<vmem>>, %arg11: memref<8x1xf32, #tpu.memory_space<vmem>>, %arg12: memref<1x2x2x8x256xf32, #tpu.memory_space<vmem>>) attributes {dimension_semantics = [#tpu.dimension_semantics<parallel>], iteration_bounds = array<i64: 2>, scalar_prefetch = 0 : i64, scratch_operands = 0 : i64, tpu.core_type = #tpu.core_type<tc>, window_params = [{transform_indices = @transform_0, window_bounds = array<i64: 1, 4, 256>}, {transform_indices = @transform_1, window_bounds = array<i64: 1, 8, 256>}, {pipeline_mode = #tpu.pipeline_mode<synchronous>, transform_indices = @transform_2, window_bounds = array<i64: 3, 3, 1, 256>}, {pipeline_mode = #tpu.pipeline_mode<synchronous>, transform_indices = @transform_3, window_bounds = array<i64: 16, 4>}, {pipeline_mode = #tpu.pipeline_mode<synchronous>, transform_indices = @transform_4, window_bounds = array<i64: 16, 1>}, {pipeline_mode = #tpu.pipeline_mode<synchronous>, transform_indices = @transform_5, window_bounds = array<i64: 4, 4, 16, 16>}, {pipeline_mode = #tpu.pipeline_mode<synchronous>, transform_indices = @transform_6, window_bounds = array<i64: 16, 1>}, {pipeline_mode = #tpu.pipeline_mode<synchronous>, transform_indices = @transform_7, window_bounds = array<i64: 8, 16>}, {pipeline_mode = #tpu.pipeline_mode<synchronous>, transform_indices = @transform_8, window_bounds = array<i64: 8, 1>}, {pipeline_mode = #tpu.pipeline_mode<synchronous>, transform_indices = @transform_9, window_bounds = array<i64: 8, 4>}, {pipeline_mode = #tpu.pipeline_mode<synchronous>, transform_indices = @transform_10, window_bounds = array<i64: 8, 1>}, {transform_indices = @transform_11, window_bounds = array<i64: 1, 2, 2, 8, 256>}]} {
    %c0 = arith.constant 0 : index
    %c0_0 = arith.constant 0 : index
    %c0_1 = arith.constant 0 : index
    %0 = vector.load %arg1[%c0, %c0_0, %c0_1] : memref<1x4x256xf32, #tpu.memory_space<vmem>>, vector<1x4x256xf32>
    %1 = vector.shape_cast %0 : vector<1x4x256xf32> to vector<4x256xf32>
    %c0_2 = arith.constant 0 : index
    %c0_3 = arith.constant 0 : index
    %c0_4 = arith.constant 0 : index
    %2 = vector.load %arg2[%c0_2, %c0_3, %c0_4] : memref<1x8x256xi8, #tpu.memory_space<vmem>>, vector<1x8x256xi8>
    %3 = vector.shape_cast %2 : vector<1x8x256xi8> to vector<8x256xi8>
    %4 = arith.extsi %3 : vector<8x256xi8> to vector<8x256xi32>
    %c0_5 = arith.constant 0 : index
    %c0_6 = arith.constant 0 : index
    %5 = vector.load %arg7[%c0_5, %c0_6] : memref<16x1xf32, #tpu.memory_space<vmem>>, vector<16x1xf32>
    %c0_7 = arith.constant 0 : index
    %c0_8 = arith.constant 0 : index
    %6 = vector.load %arg9[%c0_7, %c0_8] : memref<8x1xf32, #tpu.memory_space<vmem>>, vector<8x1xf32>
    %c0_9 = arith.constant 0 : index
    %c0_10 = arith.constant 0 : index
    %7 = vector.load %arg8[%c0_9, %c0_10] : memref<8x16xf32, #tpu.memory_space<vmem>>, vector<8x16xf32>
    %c0_11 = arith.constant 0 : index
    %c0_12 = arith.constant 0 : index
    %8 = vector.load %arg4[%c0_11, %c0_12] : memref<16x4xf32, #tpu.memory_space<vmem>>, vector<16x4xf32>
    %cst = arith.constant dense<0.000000e+00> : vector<16x256xf32>
    %9 = tpu.matmul %8, %1, %cst {dimension_numbers = #tpu.dot_dimension_numbers<[1], [0], [0], [1], [0, 0, 1, 1], [], []>} : vector<16x4xf32>, vector<4x256xf32>, vector<16x256xf32> -> vector<16x256xf32>
    %c0_13 = arith.constant 0 : index
    %c0_14 = arith.constant 0 : index
    %10 = vector.load %arg5[%c0_13, %c0_14] : memref<16x1xf32, #tpu.memory_space<vmem>>, vector<16x1xf32>
    %11 = vector.broadcast %10 : vector<16x1xf32> to vector<16x256xf32>
    %12 = arith.addf %9, %11 : vector<16x256xf32>
    %cst_15 = arith.constant 0.000000e+00 : f32
    %13 = vector.broadcast %cst_15 : f32 to vector<16x256xf32>
    %14 = arith.maximumf %12, %13 : vector<16x256xf32>
    %c0_16 = arith.constant 0 : index
    %c0_17 = arith.constant 0 : index
    %15 = vector.load %arg10[%c0_16, %c0_17] : memref<8x4xf32, #tpu.memory_space<vmem>>, vector<8x4xf32>
    %cst_18 = arith.constant dense<0.000000e+00> : vector<8x256xf32>
    %16 = tpu.matmul %15, %1, %cst_18 {dimension_numbers = #tpu.dot_dimension_numbers<[1], [0], [0], [1], [0, 0, 1, 1], [], []>} : vector<8x4xf32>, vector<4x256xf32>, vector<8x256xf32> -> vector<8x256xf32>
    %c0_19 = arith.constant 0 : index
    %c0_20 = arith.constant 0 : index
    %17 = vector.load %arg11[%c0_19, %c0_20] : memref<8x1xf32, #tpu.memory_space<vmem>>, vector<8x1xf32>
    %18 = vector.broadcast %17 : vector<8x1xf32> to vector<8x256xf32>
    %19 = arith.addf %16, %18 : vector<8x256xf32>
    %c17_i32 = arith.constant 17 : i32
    %20 = tpu.dynamic_rotate %14 by %c17_i32 dim 1 : vector<16x256xf32>, i32 -> vector<16x256xf32>
    %c0_21 = arith.constant 0 : index
    %c0_22 = arith.constant 0 : index
    %c0_23 = arith.constant 0 : index
    %c0_24 = arith.constant 0 : index
    %21 = vector.load %arg3[%c0_21, %c0_22, %c0_23, %c0_24] : memref<3x3x1x256xf32, #tpu.memory_space<vmem>>, vector<1x1x1x256xf32>
    %22 = vector.shape_cast %21 : vector<1x1x1x256xf32> to vector<1x256xf32>
    %23 = vector.broadcast %22 : vector<1x256xf32> to vector<16x256xf32>
    %24 = arith.mulf %20, %23 : vector<16x256xf32>
    %c16_i32 = arith.constant 16 : i32
    %25 = tpu.dynamic_rotate %14 by %c16_i32 dim 1 : vector<16x256xf32>, i32 -> vector<16x256xf32>
    %c0_25 = arith.constant 0 : index
    %c1 = arith.constant 1 : index
    %c0_26 = arith.constant 0 : index
    %c0_27 = arith.constant 0 : index
    %26 = vector.load %arg3[%c0_25, %c1, %c0_26, %c0_27] : memref<3x3x1x256xf32, #tpu.memory_space<vmem>>, vector<1x1x1x256xf32>
    %27 = vector.shape_cast %26 : vector<1x1x1x256xf32> to vector<1x256xf32>
    %28 = vector.broadcast %27 : vector<1x256xf32> to vector<16x256xf32>
    %29 = arith.mulf %25, %28 : vector<16x256xf32>
    %c15_i32 = arith.constant 15 : i32
    %30 = tpu.dynamic_rotate %14 by %c15_i32 dim 1 : vector<16x256xf32>, i32 -> vector<16x256xf32>
    %c0_28 = arith.constant 0 : index
    %c2 = arith.constant 2 : index
    %c0_29 = arith.constant 0 : index
    %c0_30 = arith.constant 0 : index
    %31 = vector.load %arg3[%c0_28, %c2, %c0_29, %c0_30] : memref<3x3x1x256xf32, #tpu.memory_space<vmem>>, vector<1x1x1x256xf32>
    %32 = vector.shape_cast %31 : vector<1x1x1x256xf32> to vector<1x256xf32>
    %33 = vector.broadcast %32 : vector<1x256xf32> to vector<16x256xf32>
    %34 = arith.mulf %30, %33 : vector<16x256xf32>
    %c1_i32 = arith.constant 1 : i32
    %35 = tpu.dynamic_rotate %14 by %c1_i32 dim 1 : vector<16x256xf32>, i32 -> vector<16x256xf32>
    %c1_31 = arith.constant 1 : index
    %c0_32 = arith.constant 0 : index
    %c0_33 = arith.constant 0 : index
    %c0_34 = arith.constant 0 : index
    %36 = vector.load %arg3[%c1_31, %c0_32, %c0_33, %c0_34] : memref<3x3x1x256xf32, #tpu.memory_space<vmem>>, vector<1x1x1x256xf32>
    %37 = vector.shape_cast %36 : vector<1x1x1x256xf32> to vector<1x256xf32>
    %38 = vector.broadcast %37 : vector<1x256xf32> to vector<16x256xf32>
    %39 = arith.mulf %35, %38 : vector<16x256xf32>
    %c1_35 = arith.constant 1 : index
    %c1_36 = arith.constant 1 : index
    %c0_37 = arith.constant 0 : index
    %c0_38 = arith.constant 0 : index
    %40 = vector.load %arg3[%c1_35, %c1_36, %c0_37, %c0_38] : memref<3x3x1x256xf32, #tpu.memory_space<vmem>>, vector<1x1x1x256xf32>
    %41 = vector.shape_cast %40 : vector<1x1x1x256xf32> to vector<1x256xf32>
    %42 = vector.broadcast %41 : vector<1x256xf32> to vector<16x256xf32>
    %43 = arith.mulf %14, %42 : vector<16x256xf32>
    %c255_i32 = arith.constant 255 : i32
    %44 = tpu.dynamic_rotate %14 by %c255_i32 dim 1 : vector<16x256xf32>, i32 -> vector<16x256xf32>
    %c1_39 = arith.constant 1 : index
    %c2_40 = arith.constant 2 : index
    %c0_41 = arith.constant 0 : index
    %c0_42 = arith.constant 0 : index
    %45 = vector.load %arg3[%c1_39, %c2_40, %c0_41, %c0_42] : memref<3x3x1x256xf32, #tpu.memory_space<vmem>>, vector<1x1x1x256xf32>
    %46 = vector.shape_cast %45 : vector<1x1x1x256xf32> to vector<1x256xf32>
    %47 = vector.broadcast %46 : vector<1x256xf32> to vector<16x256xf32>
    %48 = arith.mulf %44, %47 : vector<16x256xf32>
    %c241_i32 = arith.constant 241 : i32
    %49 = tpu.dynamic_rotate %14 by %c241_i32 dim 1 : vector<16x256xf32>, i32 -> vector<16x256xf32>
    %c2_43 = arith.constant 2 : index
    %c0_44 = arith.constant 0 : index
    %c0_45 = arith.constant 0 : index
    %c0_46 = arith.constant 0 : index
    %50 = vector.load %arg3[%c2_43, %c0_44, %c0_45, %c0_46] : memref<3x3x1x256xf32, #tpu.memory_space<vmem>>, vector<1x1x1x256xf32>
    %51 = vector.shape_cast %50 : vector<1x1x1x256xf32> to vector<1x256xf32>
    %52 = vector.broadcast %51 : vector<1x256xf32> to vector<16x256xf32>
    %53 = arith.mulf %49, %52 : vector<16x256xf32>
    %c240_i32 = arith.constant 240 : i32
    %54 = tpu.dynamic_rotate %14 by %c240_i32 dim 1 : vector<16x256xf32>, i32 -> vector<16x256xf32>
    %c2_47 = arith.constant 2 : index
    %c1_48 = arith.constant 1 : index
    %c0_49 = arith.constant 0 : index
    %c0_50 = arith.constant 0 : index
    %55 = vector.load %arg3[%c2_47, %c1_48, %c0_49, %c0_50] : memref<3x3x1x256xf32, #tpu.memory_space<vmem>>, vector<1x1x1x256xf32>
    %56 = vector.shape_cast %55 : vector<1x1x1x256xf32> to vector<1x256xf32>
    %57 = vector.broadcast %56 : vector<1x256xf32> to vector<16x256xf32>
    %58 = arith.mulf %54, %57 : vector<16x256xf32>
    %c239_i32 = arith.constant 239 : i32
    %59 = tpu.dynamic_rotate %14 by %c239_i32 dim 1 : vector<16x256xf32>, i32 -> vector<16x256xf32>
    %c2_51 = arith.constant 2 : index
    %c2_52 = arith.constant 2 : index
    %c0_53 = arith.constant 0 : index
    %c0_54 = arith.constant 0 : index
    %60 = vector.load %arg3[%c2_51, %c2_52, %c0_53, %c0_54] : memref<3x3x1x256xf32, #tpu.memory_space<vmem>>, vector<1x1x1x256xf32>
    %61 = vector.shape_cast %60 : vector<1x1x1x256xf32> to vector<1x256xf32>
    %62 = vector.broadcast %61 : vector<1x256xf32> to vector<16x256xf32>
    %63 = arith.mulf %59, %62 : vector<16x256xf32>
    %c1_55 = arith.constant 1 : index
    %c1_56 = arith.constant 1 : index
    %c0_57 = arith.constant 0 : index
    %c0_58 = arith.constant 0 : index
    %64 = vector.load %arg6[%c1_55, %c1_56, %c0_57, %c0_58] : memref<4x4x16x16xf32, #tpu.memory_space<vmem>>, vector<1x1x16x16xf32>
    %65 = vector.shape_cast %64 : vector<1x1x16x16xf32> to vector<16x16xf32>
    %cst_59 = arith.constant dense<0.000000e+00> : vector<16x256xf32>
    %66 = tpu.matmul %65, %43, %cst_59 {dimension_numbers = #tpu.dot_dimension_numbers<[1], [0], [0], [1], [0, 0, 1, 1], [], []>} : vector<16x16xf32>, vector<16x256xf32>, vector<16x256xf32> -> vector<16x256xf32>
    %c1_60 = arith.constant 1 : index
    %c3 = arith.constant 3 : index
    %c0_61 = arith.constant 0 : index
    %c0_62 = arith.constant 0 : index
    %67 = vector.load %arg6[%c1_60, %c3, %c0_61, %c0_62] : memref<4x4x16x16xf32, #tpu.memory_space<vmem>>, vector<1x1x16x16xf32>
    %68 = vector.shape_cast %67 : vector<1x1x16x16xf32> to vector<16x16xf32>
    %cst_63 = arith.constant dense<0.000000e+00> : vector<16x256xf32>
    %69 = tpu.matmul %68, %39, %cst_63 {dimension_numbers = #tpu.dot_dimension_numbers<[1], [0], [0], [1], [0, 0, 1, 1], [], []>} : vector<16x16xf32>, vector<16x256xf32>, vector<16x256xf32> -> vector<16x256xf32>
    %70 = arith.addf %66, %69 : vector<16x256xf32>
    %c3_64 = arith.constant 3 : index
    %c1_65 = arith.constant 1 : index
    %c0_66 = arith.constant 0 : index
    %c0_67 = arith.constant 0 : index
    %71 = vector.load %arg6[%c3_64, %c1_65, %c0_66, %c0_67] : memref<4x4x16x16xf32, #tpu.memory_space<vmem>>, vector<1x1x16x16xf32>
    %72 = vector.shape_cast %71 : vector<1x1x16x16xf32> to vector<16x16xf32>
    %cst_68 = arith.constant dense<0.000000e+00> : vector<16x256xf32>
    %73 = tpu.matmul %72, %29, %cst_68 {dimension_numbers = #tpu.dot_dimension_numbers<[1], [0], [0], [1], [0, 0, 1, 1], [], []>} : vector<16x16xf32>, vector<16x256xf32>, vector<16x256xf32> -> vector<16x256xf32>
    %74 = arith.addf %70, %73 : vector<16x256xf32>
    %c3_69 = arith.constant 3 : index
    %c3_70 = arith.constant 3 : index
    %c0_71 = arith.constant 0 : index
    %c0_72 = arith.constant 0 : index
    %75 = vector.load %arg6[%c3_69, %c3_70, %c0_71, %c0_72] : memref<4x4x16x16xf32, #tpu.memory_space<vmem>>, vector<1x1x16x16xf32>
    %76 = vector.shape_cast %75 : vector<1x1x16x16xf32> to vector<16x16xf32>
    %cst_73 = arith.constant dense<0.000000e+00> : vector<16x256xf32>
    %77 = tpu.matmul %76, %24, %cst_73 {dimension_numbers = #tpu.dot_dimension_numbers<[1], [0], [0], [1], [0, 0, 1, 1], [], []>} : vector<16x16xf32>, vector<16x256xf32>, vector<16x256xf32> -> vector<16x256xf32>
    %78 = arith.addf %74, %77 : vector<16x256xf32>
    %79 = vector.broadcast %5 : vector<16x1xf32> to vector<16x256xf32>
    %80 = arith.addf %78, %79 : vector<16x256xf32>
    %cst_74 = arith.constant 0.000000e+00 : f32
    %81 = vector.broadcast %cst_74 : f32 to vector<16x256xf32>
    %82 = arith.maximumf %80, %81 : vector<16x256xf32>
    %cst_75 = arith.constant dense<0.000000e+00> : vector<8x256xf32>
    %83 = tpu.matmul %7, %82, %cst_75 {dimension_numbers = #tpu.dot_dimension_numbers<[1], [0], [0], [1], [0, 0, 1, 1], [], []>} : vector<8x16xf32>, vector<16x256xf32>, vector<8x256xf32> -> vector<8x256xf32>
    %84 = vector.broadcast %6 : vector<8x1xf32> to vector<8x256xf32>
    %85 = arith.addf %83, %84 : vector<8x256xf32>
    %c0_i32 = arith.constant 0 : i32
    %86 = vector.broadcast %c0_i32 : i32 to vector<8x256xi32>
    %87 = arith.cmpi eq, %4, %86 : vector<8x256xi32>
    %cst_76 = arith.constant 0.000000e+00 : f32
    %88 = vector.broadcast %cst_76 : f32 to vector<8x256xf32>
    %89 = arith.select %87, %19, %88 : vector<8x256xi1>, vector<8x256xf32>
    %90 = arith.addf %85, %89 : vector<8x256xf32>
    %cst_77 = arith.constant 0.000000e+00 : f32
    %91 = vector.broadcast %cst_77 : f32 to vector<8x256xf32>
    %92 = arith.maximumf %90, %91 : vector<8x256xf32>
    %c0_78 = arith.constant 0 : index
    %c0_79 = arith.constant 0 : index
    %c0_80 = arith.constant 0 : index
    %c0_81 = arith.constant 0 : index
    %c0_82 = arith.constant 0 : index
    %93 = vector.load %arg12[%c0_78, %c0_79, %c0_80, %c0_81, %c0_82] : memref<1x2x2x8x256xf32, #tpu.memory_space<vmem>>, vector<1x1x1x8x256xf32>
    %94 = vector.shape_cast %93 : vector<1x1x1x8x256xf32> to vector<8x256xf32>
    %95 = vector.shape_cast %92 : vector<8x256xf32> to vector<1x1x1x8x256xf32>
    tpu.vector_store %arg12[%c0_78, %c0_79, %c0_80, %c0_81, %c0_82], %95 {strides = array<i32>} : memref<1x2x2x8x256xf32, #tpu.memory_space<vmem>>, vector<1x1x1x8x256xf32>,
    %c1_83 = arith.constant 1 : index
    %c0_84 = arith.constant 0 : index
    %c0_85 = arith.constant 0 : index
    %c0_86 = arith.constant 0 : index
    %96 = vector.load %arg6[%c1_83, %c0_84, %c0_85, %c0_86] : memref<4x4x16x16xf32, #tpu.memory_space<vmem>>, vector<1x1x16x16xf32>
    %97 = vector.shape_cast %96 : vector<1x1x16x16xf32> to vector<16x16xf32>
    %cst_87 = arith.constant dense<0.000000e+00> : vector<16x256xf32>
    %98 = tpu.matmul %97, %48, %cst_87 {dimension_numbers = #tpu.dot_dimension_numbers<[1], [0], [0], [1], [0, 0, 1, 1], [], []>} : vector<16x16xf32>, vector<16x256xf32>, vector<16x256xf32> -> vector<16x256xf32>
    %c1_88 = arith.constant 1 : index
    %c2_89 = arith.constant 2 : index
    %c0_90 = arith.constant 0 : index
    %c0_91 = arith.constant 0 : index
    %99 = vector.load %arg6[%c1_88, %c2_89, %c0_90, %c0_91] : memref<4x4x16x16xf32, #tpu.memory_space<vmem>>, vector<1x1x16x16xf32>
    %100 = vector.shape_cast %99 : vector<1x1x16x16xf32> to vector<16x16xf32>
    %cst_92 = arith.constant dense<0.000000e+00> : vector<16x256xf32>
    %101 = tpu.matmul %100, %43, %cst_92 {dimension_numbers = #tpu.dot_dimension_numbers<[1], [0], [0], [1], [0, 0, 1, 1], [], []>} : vector<16x16xf32>, vector<16x256xf32>, vector<16x256xf32> -> vector<16x256xf32>
    %102 = arith.addf %98, %101 : vector<16x256xf32>
    %c3_93 = arith.constant 3 : index
    %c0_94 = arith.constant 0 : index
    %c0_95 = arith.constant 0 : index
    %c0_96 = arith.constant 0 : index
    %103 = vector.load %arg6[%c3_93, %c0_94, %c0_95, %c0_96] : memref<4x4x16x16xf32, #tpu.memory_space<vmem>>, vector<1x1x16x16xf32>
    %104 = vector.shape_cast %103 : vector<1x1x16x16xf32> to vector<16x16xf32>
    %cst_97 = arith.constant dense<0.000000e+00> : vector<16x256xf32>
    %105 = tpu.matmul %104, %34, %cst_97 {dimension_numbers = #tpu.dot_dimension_numbers<[1], [0], [0], [1], [0, 0, 1, 1], [], []>} : vector<16x16xf32>, vector<16x256xf32>, vector<16x256xf32> -> vector<16x256xf32>
    %106 = arith.addf %102, %105 : vector<16x256xf32>
    %c3_98 = arith.constant 3 : index
    %c2_99 = arith.constant 2 : index
    %c0_100 = arith.constant 0 : index
    %c0_101 = arith.constant 0 : index
    %107 = vector.load %arg6[%c3_98, %c2_99, %c0_100, %c0_101] : memref<4x4x16x16xf32, #tpu.memory_space<vmem>>, vector<1x1x16x16xf32>
    %108 = vector.shape_cast %107 : vector<1x1x16x16xf32> to vector<16x16xf32>
    %cst_102 = arith.constant dense<0.000000e+00> : vector<16x256xf32>
    %109 = tpu.matmul %108, %29, %cst_102 {dimension_numbers = #tpu.dot_dimension_numbers<[1], [0], [0], [1], [0, 0, 1, 1], [], []>} : vector<16x16xf32>, vector<16x256xf32>, vector<16x256xf32> -> vector<16x256xf32>
    %110 = arith.addf %106, %109 : vector<16x256xf32>
    %111 = vector.broadcast %5 : vector<16x1xf32> to vector<16x256xf32>
    %112 = arith.addf %110, %111 : vector<16x256xf32>
    %cst_103 = arith.constant 0.000000e+00 : f32
    %113 = vector.broadcast %cst_103 : f32 to vector<16x256xf32>
    %114 = arith.maximumf %112, %113 : vector<16x256xf32>
    %cst_104 = arith.constant dense<0.000000e+00> : vector<8x256xf32>
    %115 = tpu.matmul %7, %114, %cst_104 {dimension_numbers = #tpu.dot_dimension_numbers<[1], [0], [0], [1], [0, 0, 1, 1], [], []>} : vector<8x16xf32>, vector<16x256xf32>, vector<8x256xf32> -> vector<8x256xf32>
    %116 = vector.broadcast %6 : vector<8x1xf32> to vector<8x256xf32>
    %117 = arith.addf %115, %116 : vector<8x256xf32>
    %c1_i32_105 = arith.constant 1 : i32
    %118 = vector.broadcast %c1_i32_105 : i32 to vector<8x256xi32>
    %119 = arith.cmpi eq, %4, %118 : vector<8x256xi32>
    %cst_106 = arith.constant 0.000000e+00 : f32
    %120 = vector.broadcast %cst_106 : f32 to vector<8x256xf32>
    %121 = arith.select %119, %19, %120 : vector<8x256xi1>, vector<8x256xf32>
    %122 = arith.addf %117, %121 : vector<8x256xf32>
    %cst_107 = arith.constant 0.000000e+00 : f32
    %123 = vector.broadcast %cst_107 : f32 to vector<8x256xf32>
    %124 = arith.maximumf %122, %123 : vector<8x256xf32>
    %c0_108 = arith.constant 0 : index
    %c0_109 = arith.constant 0 : index
    %c1_110 = arith.constant 1 : index
    %c0_111 = arith.constant 0 : index
    %c0_112 = arith.constant 0 : index
    %125 = vector.load %arg12[%c0_108, %c0_109, %c1_110, %c0_111, %c0_112] : memref<1x2x2x8x256xf32, #tpu.memory_space<vmem>>, vector<1x1x1x8x256xf32>
    %126 = vector.shape_cast %125 : vector<1x1x1x8x256xf32> to vector<8x256xf32>
    %127 = vector.shape_cast %124 : vector<8x256xf32> to vector<1x1x1x8x256xf32>
    tpu.vector_store %arg12[%c0_108, %c0_109, %c1_110, %c0_111, %c0_112], %127 {strides = array<i32>} : memref<1x2x2x8x256xf32, #tpu.memory_space<vmem>>, vector<1x1x1x8x256xf32>,
    %c0_113 = arith.constant 0 : index
    %c1_114 = arith.constant 1 : index
    %c0_115 = arith.constant 0 : index
    %c0_116 = arith.constant 0 : index
    %128 = vector.load %arg6[%c0_113, %c1_114, %c0_115, %c0_116] : memref<4x4x16x16xf32, #tpu.memory_space<vmem>>, vector<1x1x16x16xf32>
    %129 = vector.shape_cast %128 : vector<1x1x16x16xf32> to vector<16x16xf32>
    %cst_117 = arith.constant dense<0.000000e+00> : vector<16x256xf32>
    %130 = tpu.matmul %129, %58, %cst_117 {dimension_numbers = #tpu.dot_dimension_numbers<[1], [0], [0], [1], [0, 0, 1, 1], [], []>} : vector<16x16xf32>, vector<16x256xf32>, vector<16x256xf32> -> vector<16x256xf32>
    %c0_118 = arith.constant 0 : index
    %c3_119 = arith.constant 3 : index
    %c0_120 = arith.constant 0 : index
    %c0_121 = arith.constant 0 : index
    %131 = vector.load %arg6[%c0_118, %c3_119, %c0_120, %c0_121] : memref<4x4x16x16xf32, #tpu.memory_space<vmem>>, vector<1x1x16x16xf32>
    %132 = vector.shape_cast %131 : vector<1x1x16x16xf32> to vector<16x16xf32>
    %cst_122 = arith.constant dense<0.000000e+00> : vector<16x256xf32>
    %133 = tpu.matmul %132, %53, %cst_122 {dimension_numbers = #tpu.dot_dimension_numbers<[1], [0], [0], [1], [0, 0, 1, 1], [], []>} : vector<16x16xf32>, vector<16x256xf32>, vector<16x256xf32> -> vector<16x256xf32>
    %134 = arith.addf %130, %133 : vector<16x256xf32>
    %c2_123 = arith.constant 2 : index
    %c1_124 = arith.constant 1 : index
    %c0_125 = arith.constant 0 : index
    %c0_126 = arith.constant 0 : index
    %135 = vector.load %arg6[%c2_123, %c1_124, %c0_125, %c0_126] : memref<4x4x16x16xf32, #tpu.memory_space<vmem>>, vector<1x1x16x16xf32>
    %136 = vector.shape_cast %135 : vector<1x1x16x16xf32> to vector<16x16xf32>
    %cst_127 = arith.constant dense<0.000000e+00> : vector<16x256xf32>
    %137 = tpu.matmul %136, %43, %cst_127 {dimension_numbers = #tpu.dot_dimension_numbers<[1], [0], [0], [1], [0, 0, 1, 1], [], []>} : vector<16x16xf32>, vector<16x256xf32>, vector<16x256xf32> -> vector<16x256xf32>
    %138 = arith.addf %134, %137 : vector<16x256xf32>
    %c2_128 = arith.constant 2 : index
    %c3_129 = arith.constant 3 : index
    %c0_130 = arith.constant 0 : index
    %c0_131 = arith.constant 0 : index
    %139 = vector.load %arg6[%c2_128, %c3_129, %c0_130, %c0_131] : memref<4x4x16x16xf32, #tpu.memory_space<vmem>>, vector<1x1x16x16xf32>
    %140 = vector.shape_cast %139 : vector<1x1x16x16xf32> to vector<16x16xf32>
    %cst_132 = arith.constant dense<0.000000e+00> : vector<16x256xf32>
    %141 = tpu.matmul %140, %39, %cst_132 {dimension_numbers = #tpu.dot_dimension_numbers<[1], [0], [0], [1], [0, 0, 1, 1], [], []>} : vector<16x16xf32>, vector<16x256xf32>, vector<16x256xf32> -> vector<16x256xf32>
    %142 = arith.addf %138, %141 : vector<16x256xf32>
    %143 = vector.broadcast %5 : vector<16x1xf32> to vector<16x256xf32>
    %144 = arith.addf %142, %143 : vector<16x256xf32>
    %cst_133 = arith.constant 0.000000e+00 : f32
    %145 = vector.broadcast %cst_133 : f32 to vector<16x256xf32>
    %146 = arith.maximumf %144, %145 : vector<16x256xf32>
    %cst_134 = arith.constant dense<0.000000e+00> : vector<8x256xf32>
    %147 = tpu.matmul %7, %146, %cst_134 {dimension_numbers = #tpu.dot_dimension_numbers<[1], [0], [0], [1], [0, 0, 1, 1], [], []>} : vector<8x16xf32>, vector<16x256xf32>, vector<8x256xf32> -> vector<8x256xf32>
    %148 = vector.broadcast %6 : vector<8x1xf32> to vector<8x256xf32>
    %149 = arith.addf %147, %148 : vector<8x256xf32>
    %c2_i32 = arith.constant 2 : i32
    %150 = vector.broadcast %c2_i32 : i32 to vector<8x256xi32>
    %151 = arith.cmpi eq, %4, %150 : vector<8x256xi32>
    %cst_135 = arith.constant 0.000000e+00 : f32
    %152 = vector.broadcast %cst_135 : f32 to vector<8x256xf32>
    %153 = arith.select %151, %19, %152 : vector<8x256xi1>, vector<8x256xf32>
    %154 = arith.addf %149, %153 : vector<8x256xf32>
    %cst_136 = arith.constant 0.000000e+00 : f32
    %155 = vector.broadcast %cst_136 : f32 to vector<8x256xf32>
    %156 = arith.maximumf %154, %155 : vector<8x256xf32>
    %c0_137 = arith.constant 0 : index
    %c1_138 = arith.constant 1 : index
    %c0_139 = arith.constant 0 : index
    %c0_140 = arith.constant 0 : index
    %c0_141 = arith.constant 0 : index
    %157 = vector.load %arg12[%c0_137, %c1_138, %c0_139, %c0_140, %c0_141] : memref<1x2x2x8x256xf32, #tpu.memory_space<vmem>>, vector<1x1x1x8x256xf32>
    %158 = vector.shape_cast %157 : vector<1x1x1x8x256xf32> to vector<8x256xf32>
    %159 = vector.shape_cast %156 : vector<8x256xf32> to vector<1x1x1x8x256xf32>
    tpu.vector_store %arg12[%c0_137, %c1_138, %c0_139, %c0_140, %c0_141], %159 {strides = array<i32>} : memref<1x2x2x8x256xf32, #tpu.memory_space<vmem>>, vector<1x1x1x8x256xf32>,
    %c0_142 = arith.constant 0 : index
    %c0_143 = arith.constant 0 : index
    %c0_144 = arith.constant 0 : index
    %c0_145 = arith.constant 0 : index
    %160 = vector.load %arg6[%c0_142, %c0_143, %c0_144, %c0_145] : memref<4x4x16x16xf32, #tpu.memory_space<vmem>>, vector<1x1x16x16xf32>
    %161 = vector.shape_cast %160 : vector<1x1x16x16xf32> to vector<16x16xf32>
    %cst_146 = arith.constant dense<0.000000e+00> : vector<16x256xf32>
    %162 = tpu.matmul %161, %63, %cst_146 {dimension_numbers = #tpu.dot_dimension_numbers<[1], [0], [0], [1], [0, 0, 1, 1], [], []>} : vector<16x16xf32>, vector<16x256xf32>, vector<16x256xf32> -> vector<16x256xf32>
    %c0_147 = arith.constant 0 : index
    %c2_148 = arith.constant 2 : index
    %c0_149 = arith.constant 0 : index
    %c0_150 = arith.constant 0 : index
    %163 = vector.load %arg6[%c0_147, %c2_148, %c0_149, %c0_150] : memref<4x4x16x16xf32, #tpu.memory_space<vmem>>, vector<1x1x16x16xf32>
    %164 = vector.shape_cast %163 : vector<1x1x16x16xf32> to vector<16x16xf32>
    %cst_151 = arith.constant dense<0.000000e+00> : vector<16x256xf32>
    %165 = tpu.matmul %164, %58, %cst_151 {dimension_numbers = #tpu.dot_dimension_numbers<[1], [0], [0], [1], [0, 0, 1, 1], [], []>} : vector<16x16xf32>, vector<16x256xf32>, vector<16x256xf32> -> vector<16x256xf32>
    %166 = arith.addf %162, %165 : vector<16x256xf32>
    %c2_152 = arith.constant 2 : index
    %c0_153 = arith.constant 0 : index
    %c0_154 = arith.constant 0 : index
    %c0_155 = arith.constant 0 : index
    %167 = vector.load %arg6[%c2_152, %c0_153, %c0_154, %c0_155] : memref<4x4x16x16xf32, #tpu.memory_space<vmem>>, vector<1x1x16x16xf32>
    %168 = vector.shape_cast %167 : vector<1x1x16x16xf32> to vector<16x16xf32>
    %cst_156 = arith.constant dense<0.000000e+00> : vector<16x256xf32>
    %169 = tpu.matmul %168, %48, %cst_156 {dimension_numbers = #tpu.dot_dimension_numbers<[1], [0], [0], [1], [0, 0, 1, 1], [], []>} : vector<16x16xf32>, vector<16x256xf32>, vector<16x256xf32> -> vector<16x256xf32>
    %170 = arith.addf %166, %169 : vector<16x256xf32>
    %c2_157 = arith.constant 2 : index
    %c2_158 = arith.constant 2 : index
    %c0_159 = arith.constant 0 : index
    %c0_160 = arith.constant 0 : index
    %171 = vector.load %arg6[%c2_157, %c2_158, %c0_159, %c0_160] : memref<4x4x16x16xf32, #tpu.memory_space<vmem>>, vector<1x1x16x16xf32>
    %172 = vector.shape_cast %171 : vector<1x1x16x16xf32> to vector<16x16xf32>
    %cst_161 = arith.constant dense<0.000000e+00> : vector<16x256xf32>
    %173 = tpu.matmul %172, %43, %cst_161 {dimension_numbers = #tpu.dot_dimension_numbers<[1], [0], [0], [1], [0, 0, 1, 1], [], []>} : vector<16x16xf32>, vector<16x256xf32>, vector<16x256xf32> -> vector<16x256xf32>
    %174 = arith.addf %170, %173 : vector<16x256xf32>
    %175 = vector.broadcast %5 : vector<16x1xf32> to vector<16x256xf32>
    %176 = arith.addf %174, %175 : vector<16x256xf32>
    %cst_162 = arith.constant 0.000000e+00 : f32
    %177 = vector.broadcast %cst_162 : f32 to vector<16x256xf32>
    %178 = arith.maximumf %176, %177 : vector<16x256xf32>
    %cst_163 = arith.constant dense<0.000000e+00> : vector<8x256xf32>
    %179 = tpu.matmul %7, %178, %cst_163 {dimension_numbers = #tpu.dot_dimension_numbers<[1], [0], [0], [1], [0, 0, 1, 1], [], []>} : vector<8x16xf32>, vector<16x256xf32>, vector<8x256xf32> -> vector<8x256xf32>
    %180 = vector.broadcast %6 : vector<8x1xf32> to vector<8x256xf32>
    %181 = arith.addf %179, %180 : vector<8x256xf32>
    %c3_i32 = arith.constant 3 : i32
    %182 = vector.broadcast %c3_i32 : i32 to vector<8x256xi32>
    %183 = arith.cmpi eq, %4, %182 : vector<8x256xi32>
    %cst_164 = arith.constant 0.000000e+00 : f32
    %184 = vector.broadcast %cst_164 : f32 to vector<8x256xf32>
    %185 = arith.select %183, %19, %184 : vector<8x256xi1>, vector<8x256xf32>
    %186 = arith.addf %181, %185 : vector<8x256xf32>
    %cst_165 = arith.constant 0.000000e+00 : f32
    %187 = vector.broadcast %cst_165 : f32 to vector<8x256xf32>
    %188 = arith.maximumf %186, %187 : vector<8x256xf32>
    %c0_166 = arith.constant 0 : index
    %c1_167 = arith.constant 1 : index
    %c1_168 = arith.constant 1 : index
    %c0_169 = arith.constant 0 : index
    %c0_170 = arith.constant 0 : index
    %189 = vector.load %arg12[%c0_166, %c1_167, %c1_168, %c0_169, %c0_170] : memref<1x2x2x8x256xf32, #tpu.memory_space<vmem>>, vector<1x1x1x8x256xf32>
    %190 = vector.shape_cast %189 : vector<1x1x1x8x256xf32> to vector<8x256xf32>
    %191 = vector.shape_cast %188 : vector<8x256xf32> to vector<1x1x1x8x256xf32>
    tpu.vector_store %arg12[%c0_166, %c1_167, %c1_168, %c0_169, %c0_170], %191 {strides = array<i32>} : memref<1x2x2x8x256xf32, #tpu.memory_space<vmem>>, vector<1x1x1x8x256xf32>,
    return
  }
  func.func @transform_0(%arg0: i32) -> (i32, i32, i32) {
    %c0_i32 = arith.constant 0 : i32
    %c0_i32_0 = arith.constant 0 : i32
    %c0_i32_1 = arith.constant 0 : i32
    return %arg0, %c0_i32, %c0_i32_0 : i32, i32, i32
  }
  func.func @transform_1(%arg0: i32) -> (i32, i32, i32) {
    %c0_i32 = arith.constant 0 : i32
    %c0_i32_0 = arith.constant 0 : i32
    %c0_i32_1 = arith.constant 0 : i32
    return %arg0, %c0_i32, %c0_i32_0 : i32, i32, i32
  }
  func.func @transform_2(%arg0: i32) -> (i32, i32, i32, i32) {
    %c0_i32 = arith.constant 0 : i32
    %c0_i32_0 = arith.constant 0 : i32
    %c0_i32_1 = arith.constant 0 : i32
    %c0_i32_2 = arith.constant 0 : i32
    %c0_i32_3 = arith.constant 0 : i32
    return %c0_i32, %c0_i32_0, %c0_i32_1, %c0_i32_2 : i32, i32, i32, i32
  }
  func.func @transform_3(%arg0: i32) -> (i32, i32) {
    %c0_i32 = arith.constant 0 : i32
    %c0_i32_0 = arith.constant 0 : i32
    %c0_i32_1 = arith.constant 0 : i32
    return %c0_i32, %c0_i32_0 : i32, i32
  }
  func.func @transform_4(%arg0: i32) -> (i32, i32) {
    %c0_i32 = arith.constant 0 : i32
    %c0_i32_0 = arith.constant 0 : i32
    %c0_i32_1 = arith.constant 0 : i32
    return %c0_i32, %c0_i32_0 : i32, i32
  }
  func.func @transform_5(%arg0: i32) -> (i32, i32, i32, i32) {
    %c0_i32 = arith.constant 0 : i32
    %c0_i32_0 = arith.constant 0 : i32
    %c0_i32_1 = arith.constant 0 : i32
    %c0_i32_2 = arith.constant 0 : i32
    %c0_i32_3 = arith.constant 0 : i32
    return %c0_i32, %c0_i32_0, %c0_i32_1, %c0_i32_2 : i32, i32, i32, i32
  }
  func.func @transform_6(%arg0: i32) -> (i32, i32) {
    %c0_i32 = arith.constant 0 : i32
    %c0_i32_0 = arith.constant 0 : i32
    %c0_i32_1 = arith.constant 0 : i32
    return %c0_i32, %c0_i32_0 : i32, i32
  }
  func.func @transform_7(%arg0: i32) -> (i32, i32) {
    %c0_i32 = arith.constant 0 : i32
    %c0_i32_0 = arith.constant 0 : i32
    %c0_i32_1 = arith.constant 0 : i32
    return %c0_i32, %c0_i32_0 : i32, i32
  }
  func.func @transform_8(%arg0: i32) -> (i32, i32) {
    %c0_i32 = arith.constant 0 : i32
    %c0_i32_0 = arith.constant 0 : i32
    %c0_i32_1 = arith.constant 0 : i32
    return %c0_i32, %c0_i32_0 : i32, i32
  }
  func.func @transform_9(%arg0: i32) -> (i32, i32) {
    %c0_i32 = arith.constant 0 : i32
    %c0_i32_0 = arith.constant 0 : i32
    %c0_i32_1 = arith.constant 0 : i32
    return %c0_i32, %c0_i32_0 : i32, i32
  }
  func.func @transform_10(%arg0: i32) -> (i32, i32) {
    %c0_i32 = arith.constant 0 : i32
    %c0_i32_0 = arith.constant 0 : i32
    %c0_i32_1 = arith.constant 0 : i32
    return %c0_i32, %c0_i32_0 : i32, i32
  }
  func.func @transform_11(%arg0: i32) -> (i32, i32, i32, i32, i32) {
    %c0_i32 = arith.constant 0 : i32
    %c0_i32_0 = arith.constant 0 : i32
    %c0_i32_1 = arith.constant 0 : i32
    %c0_i32_2 = arith.constant 0 : i32
    %c0_i32_3 = arith.constant 0 : i32
    return %arg0, %c0_i32, %c0_i32_0, %c0_i32_1, %c0_i32_2 : i32, i32, i32, i32, i32
  }
}

</mosaic_0001>

<bundles_post_ra>
// kernel: tpu_custom_call.1
= control target key start
LH: loop header
LB: loop body
LE: loop exit
PB: predicated region body
PF: predicated region fallthrough
CT: control target
= control target key end

     0   :  { %16 = vsyncpa [#allocation3], 0  ;;  %s3773_s0 = inlined_call_operand.vmem [shape: f32[2,4,256], index: 0, kind: input, shape index: {}]   ;;  %s3774_s1 = inlined_call_operand.vmem [shape: s8[2,8,256], index: 1, kind: input, shape index: {}]   ;;  %s3775_s2 = inlined_call_operand.vmem [shape: f32[3,3,1,256], index: 2, kind: input, shape index: {}]   ;;  %s3776_s3 = inlined_call_operand.vmem [shape: f32[16,4], index: 3, kind: input, shape index: {}]   ;;  %s3777_s4 = inlined_call_operand.vmem [shape: f32[16,1], index: 4, kind: input, shape index: {}]   ;;  %s3778_s5 = inlined_call_operand.hbm [shape: f32[4,4,16,16], index: 5, kind: input, shape index: {}]   ;;  %s3779_s6 = inlined_call_operand.vmem [shape: f32[16,1], index: 6, kind: input, shape index: {}]   ;;  %s3780_s7 = inlined_call_operand.vmem [shape: f32[8,16], index: 7, kind: input, shape index: {}]   ;;  %s3781_s8 = inlined_call_operand.vmem [shape: f32[8,1], index: 8, kind: input, shape index: {}]   ;;  %s3782_s9 = inlined_call_operand.vmem [shape: f32[8,4], index: 9, kind: input, shape index: {}]   ;;  %s3783_s10 = inlined_call_operand.vmem [shape: f32[8,1], index: 10, kind: input, shape index: {}]   ;;  %s3784_s11 = inlined_call_operand.hbm [shape: f32[2,2,2,8,256], index: 11, kind: output, shape index: {}]  }
   0x1   :  { %17 = vsyncpa [#allocation4], 0 }
   0x2   :  { %19 = vsyncpa [#allocation4 + $0x1], 0  ;;  %s3202_s17 = smov 0   ;;  %s3204_s18 = smov 0  }
   0x3   :  { %s3206_s19 = smov 0   ;;  %s3208_s20 = smov 0  }
   0x4 LB: > { %s3223_s21 = sadd.s32 4294967295, %s3125_s20   ;;  %s2761_s22 = sadd.s32 4294967294, %s3125_s20   ;;  %s3125_s20 = sphi %s3208_s20, %s3804_s20   ;;  %s3121_s19 = sphi %s3206_s19, %s3803_s19   ;;  %s3117_s18 = sphi %s3204_s18, %s3802_s18   ;;  %s3113_s17 = sphi %s3202_s17, %s3801_s17  }
   0x5   : > { %s3227_s23 = sadd.s32 1, %s3125_s20   ;;  %s273_s24 = sadd.s32 1, %s3121_s19 }
   0x6   : > { %s270_s25 = ssub.s32 %s3125_s20, %s3227_s23  ;;  %p283_p0 = scmp.ne.s32.totalorder %s3121_s19, %s3117_s18 }
   0x7   : > { %p271_p1 = scmp.eq.s32.totalorder %s270_s25, 0  ;;  %p284_p2 = scmp.eq.s32.totalorder %s3223_s21, 1 }
   0x8   : > { %p289_p3 = scmp.ne.s32.totalorder %s3117_s18, %s3113_s17  ;;  %p290_p4 = scmp.eq.s32.totalorder %s2761_s22, 1 }
   0x9   : > { %s3238_s26 = scalar_select %p271_p1, %s3121_s19, %s273_s24  }
   0xa   : > { %p3240_p5 = por %p284_p2, %p283_p0  ;;  %p3244_p6 = por %p290_p4, %p289_p3 }
   0xb   : > { %3789 = sst [smem:[#allocation8_spill]] %s3238_s26  ;;  %p2762_p7 = scmp.ge.s32.totalorder %s3125_s20, 1 }
   0xc   : > { %s3790_s27 = scalar_select %p3240_p5, 1, 0 }
   0xd   : > { %s3791_s28 = scalar_select %p3244_p6, 1, 0 }
   0xe   : > { %p297_p8 = scmp.lt.s32.totalorder %s3125_s20, 3  ;;  %p3785_p9 = scmp.eq.s32.totalorder %s3223_s21, 0 }
   0xf   : > { %s3127_s30 = smov [#allocation2]   ;;  %s3031_s16 = scalar_lea.hbm %s3778_s5, 4096 }
  0x10   : > { %p3251_p10 = pnand %p2762_p7, %p297_p8  ;;  %s318_s12 = sshll.u32 %s3127_s30, 4  ;;  %s319_s12 = int_to_ptr.vmem [resolvable:$true] %s318_s12 }
  0x11   : > { %p3032_p13 = scmp.ne.s32.totalorder %s3778_s5, %s3031_s16  ;;  %p3038_p3 = scmp.lt.u32.totalorder %s3031_s16, %s3778_s5 }
  0x12   : > { %s3792_s29 = scalar_select %p3251_p10, 1, 0 }
  0x13   : > { %p2971_p11 = pneg %p3251_p10 }
  0x15   : > { %p3259_p12 = pnand %p3785_p9, %p2971_p11 }
  0x17   : > { %p3033_p0 = pneg %p3259_p12 }
  0x19   : > { %p3034_p1 = pnand %p3033_p0, %p3032_p13 }
  0x1b   : > { %p3035_p2 = pneg %p3034_p1 }
  0x1d   : > { %p3040_p4 = pnand %p3038_p3, %p3035_p2 }
  0x1f   : > { %3043 = shalt.err (!%p3040_p4)
}
  0x20   : > { %s3044_s26 = scalar_lea.vmem %s319_s12, 4096  ;;  %p3052_p9 = scmp.lt.s32.totalorder %s319_s12, %s319_s12 }
  0x21   : > { %p3045_p7 = scmp.ne.s32.totalorder %s319_s12, %s3044_s26  ;;  %p3053_p6 = scmp.lt.s32.totalorder %s3044_s26, %s3044_s26 }
  0x23   : > { %p3047_p8 = pnand %p3045_p7, %p3033_p0  ;;  %p3054_p5 = por %p3053_p6, %p3052_p9 }
  0x25   : > { %p3048_p11 = pneg %p3047_p8 }
  0x27   : > { %p3055_p10 = pnand %p3054_p5, %p3048_p11 }
  0x29   : > { %3058 = shalt.err (!%p3055_p10)
}
  0x2a   : > { %s3128_s14 = smov 128   ;;  %s3129_s15 = smov 8  }
  0x2b   : > { %2974 = dma.hbm_to_vmem [thread:$0]  (!%p3259_p12), %s3778_s5, 4096, %s319_s12, [#allocation3], %s3128_s14, %s3128_s14, %s3129_s15  }
  0x2c   : > { %p3794_p13 = scmp.ne.s32.totalorder %s3792_s29, 0 }
  0x2d   : > { %p3795_p1 = scmp.eq.s32.totalorder (!%p3794_p13), %s3223_s21, 0 }
  0x2e   : > { %365 = sbr.rel (%p3794_p13) target bundleno = 1663 (0x67f), region = 64 }
  0x35   : > { %3104 = dma.done.wait (%p3795_p1), [#allocation3], 4096   ;;  %p3796_p0 = pmov %p3795_p1 }
  0x36   : > { %p410_p5 = scmp.lt.s32.totalorder %s3223_s21, 1  ;;  %v3130_v0 = vmov 0.0   ;;  %v3131_v1 = vmov 0   ;;  %vm451_vm0 = vcmask 1043456   ;;  %v430_v4 = vld [vmem:[%s3777_s4] sm:$0xff]  ;;  %vm444_vm1 = vcmask 31744  }
  0x37   : > { %3106 = vsyncadd (%p3796_p0), [#allocation3], 4294963200  ;;  %520 = vmatprep.mubr.f32.mxu0 %v3130_v0  ;;  %611 = vmatprep.mubr.f32.mxu1 %v3130_v0  ;;  %v428_v5 = vld [vmem:[%s3776_s3] sm:$0xff]  ;;  %v431_v7 = vld [vmem:[%s3777_s4 + $0x8] sm:$0xff]  ;;  %v626_v9 = vlaneseq  ;;  %s3132_s14 = smov 1   ;;  %s3788_s15 = smov 16  }
  0x38   : > { %s3289_s26 = scalar_select %p410_p5, %s3223_s21, 1  ;;  %3028 = vset.pattern.permute.xlu0 %v3131_v1  ;;  %3029 = vset.pattern.permute.xlu1 %v3131_v1  ;;  %v537_v6 = vld [vmem:[%s3782_s9] sm:$0xff]  ;;  %v429_v8 = vld [vmem:[%s3776_s3 + $0x8] sm:$0xff]  ;;  %vm882_vm4 = vcmask 130048  }
  0x39   : > { %434 = vperm.xlu0 %3028, %v430_v4   ;;  %v636_v10 = vshrl.u32 %v626_v9, 7  ;;  %v2782_v18 = vld [vmem:[%s3775_s2 + $0x8] sm:$0x3]  ;;  %s3134_s22 = smov 17   ;;  %v424_v36 = vld [vmem:[%s3779_s6] sm:$0xff]  ;;  %s3136_s25 = smov 15  }
  0x3a   : > { %s2834_s29 = sshll.u32 %s3289_s26, 3  ;;  %v425_v37 = vld [vmem:[%s3779_s6 + $0x8] sm:$0xff]  ;;  %s3137_s30 = smov 113   ;;  %v538_v38 = vld [vmem:[%s3783_s10] sm:$0xff]  ;;  %v3348_v43 = vand.u32 127, %v626_v9  ;;  %v880_v4 = vld [vmem:[#allocation2 + $0x70] sm:$0xff] }
  0x3b   : > { %s414_s16 = scalar_lea.vmem %s3773_s0, %s2834_s29  ;;  %v3314_v15 = vsub.s32 0, %v636_v10  ;;  %v3316_v17 = vsub.s32 1, %v636_v10  ;;  %s3135_s29 = smov 127   ;;  %v426_v41 = vld [vmem:[%s3781_s8] sm:$0xff] }
  0x3c   : > { %v420_v2 = vld [vmem:[%s414_s16] sm:$0xff]  ;;  %vm717_vm2 = vcmp.lt.s32.totalorder %v3348_v43, 1  ;;  %vm657_vm3 = vcmp.lt.s32.totalorder %v3348_v43, 16  ;;  %vm628_vm5 = vcmp.lt.s32.totalorder %v3348_v43, 17  ;;  %s2835_s12 = sshll.u32 %s3289_s26, 2  ;;  %vm854_vm6 = vcmp.lt.s32.totalorder %v3348_v43, 111 }
  0x3d   : > { %v443_v3 = vcombine.high %v420_v2, %v420_v2  ;;  %439 = vperm.xlu0 %3028, %v431_v7   ;;  %v745_v25 = vrot.slane %v2782_v18, %v3314_v15  ;;  %v749_v27 = vrot.slane %v2782_v18, %v3316_v17  ;;  %v2781_v45 = vld [vmem:[%s3775_s2 + $0x6] sm:$0x3]  ;;  %v2779_v60 = vld [vmem:[%s3775_s2 + $0x2] sm:$0x3]  ;;  %s419_s16 = scalar_lea.vmem %s3774_s1, %s2835_s12  ;;  %vm764_vm15 = vcmp.lt.s32.totalorder %v3348_v43, 127  ;;  %s407_s13 = sand.u32 1, %s3117_s18  }
  0x3e   : > { %v728_v48 = vrot.slane %v2781_v45, %v3314_v15  ;;  %v732_v49 = vrot.slane %v2781_v45, %v3316_v17  ;;  %v672_v1 = vrot.slane %v2779_v60, %v3316_v17  ;;  %v668_v10 = vrot.slane %v2779_v60, %v3314_v15  ;;  %s2836_s12 = sshll.u32 %s3223_s21, 10  ;;  %s3731_s26 = scalar_lea.sflag [#allocation4], %s407_s13 }
  0x3f   : > { %2772 = vmatprep.subr.msk.mxu0 %vm451_vm0, %v443_v3  ;;  %2776 = vmatprep.subr.msk.mxu1 %vm451_vm0, %v443_v3  ;;  %p3797_p9 = scmp.ne.s32.totalorder %s3790_s27, 0 }
  0x40   : > { %2773 = vmatpush1.msk.msra.mxu0 %vm451_vm0, %v420_v2  ;;  %2777 = vmatpush1.msk.msra.mxu1 %vm451_vm0, %v420_v2  ;;  %vm687_vm0 = vcmp.lt.s32.totalorder %v3348_v43, 15 }
  0x41   : > { %2774 = vmatmul.mubr.msk.f32.vlgmr.msra.gmra.mrb[0].mxu0 %vm444_vm1, %v428_v5  ;;  %2778 = vmatmul.mubr.msk.f32.vlgmr.msra.gmra.mrb[0].mxu1 %vm444_vm1, %v537_v6 }
  0x42   : > { %526 = vmatprep.mubr.f32.mxu0 %v3130_v0  ;;  %953 = vmatprep.mubr.f32.mxu1 %v3130_v0 }
  0x45   : > { %2775 = vmatmul.mubr.msk.f32.gmra.mrb[2].mxu0 %vm444_vm1, %v429_v8  ;;  %vm794_vm1 = vcmp.lt.s32.totalorder %v3348_v43, 113 }
  0x46   : > { %1319 = vmatprep.mubr.f32.mxu0 %v3130_v0 }
  0xb8   : > { %v435_v11 = vpop.permute.xlu0 %434 }
  0xbc   : > { %v440_v20 = vpop.permute.xlu0 %439 }
 0x114   : > { %v522_v12 = vpop.f32.mrb[0].mxu0  ;;  %v3340_v39 = vpop.f32.mrb[0].mxu1 }
 0x115   : > { %v523_v13 = vadd.f32 %v522_v12, %v435_v11  ;;  %v524_v14 = vpop.f32.mrb[1].mxu0  ;;  %v3342_v40 = vpop.f32.mrb[1].mxu1  ;;  %v881_v12 = vld [vmem:[#allocation2 + $0x78] sm:$0xff] }
 0x116   : > { %v525_v16 = vadd.f32 %v524_v14, %v435_v11  ;;  %v633_v11 = vld [vmem:[%s3775_s2] sm:$0x3] }
 0x117   : > { %v533_v19 = vmax.f32 %v523_v13, 0.0 }
 0x118   : > { %v534_v21 = vmax.f32 %v525_v16, 0.0  ;;  %v528_v22 = vpop.f32.mrb[2].mxu0 }
 0x119   : > { %v529_v23 = vadd.f32 %v528_v22, %v440_v20  ;;  %v530_v24 = vpop.f32.mrb[3].mxu0  ;;  %709 = vrot.lane.b32.xlu1 %v533_v19, %s3132_s14  ;;  %v752_v30 = vmul.f32 %v745_v25, %v533_v19 }
 0x11a   : > { %v531_v26 = vadd.f32 %v530_v24, %v440_v20  ;;  %713 = vrot.lane.b32.xlu0 %v534_v21, %s3132_s14  ;;  %v753_v32 = vmul.f32 %v749_v27, %v534_v21  ;;  %v642_v20 = vrot.slane %v633_v11, %v3316_v17 }
 0x11b   : > { %v535_v28 = vmax.f32 %v529_v23, 0.0  ;;  %v877_v23 = vld [vmem:[#allocation2 + $0x50] sm:$0xff] }
 0x11c   : > { %v536_v29 = vmax.f32 %v531_v26, 0.0 }
 0x11d   : > { %711 = vrot.lane.b32.xlu1 %v535_v28, %s3132_s14  ;;  %v754_v31 = vmul.f32 %v745_v25, %v535_v28 }
 0x11e   : > { %649 = vrot.lane.b32.xlu0 %v533_v19, %s3788_s15  ;;  %v755_v33 = vmul.f32 %v749_v27, %v536_v29 }
 0x11f   : > { %v3324_v34 = vpack.c.bf16 %v754_v31, %v752_v30  ;;  %v638_v30 = vrot.slane %v633_v11, %v3314_v15  ;;  %v878_v31 = vld [vmem:[#allocation2 + $0x58] sm:$0xff] }
 0x120   : > { %v3326_v35 = vpack.c.bf16 %v755_v33, %v753_v32 }
 0x121   : > { %715 = vrot.lane.b32.xlu1 %v536_v29, %s3132_s14  ;;  %s3138_s14 = smov 112  }
 0x122   : > { %653 = vrot.lane.b32.xlu0 %v534_v21, %s3788_s15 }
 0x125   : > { %651 = vrot.lane.b32.xlu1 %v535_v28, %s3788_s15 }
 0x126   : > { %618 = vrot.lane.b32.xlu0 %v533_v19, %s3134_s22 }
 0x129   : > { %655 = vrot.lane.b32.xlu1 %v536_v29, %s3788_s15 }
 0x12a   : > { %622 = vrot.lane.b32.xlu0 %v534_v21, %s3134_s22 }
 0x12d   : > { %620 = vrot.lane.b32.xlu1 %v535_v28, %s3134_s22 }
 0x12e   : > { %1231 = vperm.xlu0 %3028, %v424_v36  }
 0x131   : > { %624 = vrot.lane.b32.xlu1 %v536_v29, %s3134_s22  ;;  %s3139_s22 = smov 111  }
 0x132   : > { %756 = vrot.lane.b32.xlu0 %v533_v19, %s3135_s29 }
 0x135   : > { %1236 = vperm.xlu1 %3029, %v425_v37  }
 0x136   : > { %760 = vrot.lane.b32.xlu0 %v534_v21, %s3135_s29 }
 0x139   : > { %758 = vrot.lane.b32.xlu1 %v535_v28, %s3135_s29 }
 0x13a   : > { %679 = vrot.lane.b32.xlu0 %v533_v19, %s3136_s25 }
 0x13d   : > { %762 = vrot.lane.b32.xlu1 %v536_v29, %s3135_s29 }
 0x13e   : > { %683 = vrot.lane.b32.xlu0 %v534_v21, %s3136_s25 }
 0x141   : > { %681 = vrot.lane.b32.xlu1 %v535_v28, %s3136_s25 }
 0x142   : > { %786 = vrot.lane.b32.xlu0 %v533_v19, %s3137_s30 }
 0x145   : > { %685 = vrot.lane.b32.xlu1 %v536_v29, %s3136_s25 }
 0x146   : > { %790 = vrot.lane.b32.xlu0 %v534_v21, %s3137_s30 }
 0x149   : > { %788 = vrot.lane.b32.xlu1 %v535_v28, %s3137_s30 }
 0x14a   : > { %816 = vrot.lane.b32.xlu0 %v533_v19, %s3138_s14 }
 0x14d   : > { %792 = vrot.lane.b32.xlu1 %v536_v29, %s3137_s30  ;;  %s3725_s30 = scalar_lea.hbm %s3784_s11, %s2836_s12 }
 0x14e   : > { %820 = vrot.lane.b32.xlu0 %v534_v21, %s3138_s14 }
 0x151   : > { %818 = vrot.lane.b32.xlu1 %v535_v28, %s3138_s14 }
 0x152   : > { %846 = vrot.lane.b32.xlu0 %v533_v19, %s3139_s22 }
 0x155   : > { %822 = vrot.lane.b32.xlu1 %v536_v29, %s3138_s14  ;;  %s3140_s14 = smov [#allocation5]  }
 0x156   : > { %850 = vrot.lane.b32.xlu0 %v534_v21, %s3139_s22 }
 0x159   : > { %848 = vrot.lane.b32.xlu1 %v535_v28, %s3139_s22 }
 0x15a   : > { %541 = vperm.xlu0 %3028, %v538_v38   ;;  %v1050_v38 = vld [vmem:[#allocation2 + $0xd0] sm:$0xff] }
 0x15d   : > { %852 = vrot.lane.b32.xlu1 %v536_v29, %s3139_s22  ;;  %s3063_s22 = sshll.u32 %s3140_s14, 4  ;;  %s3064_s22 = int_to_ptr.vmem [resolvable:$false] %s3063_s22 }
 0x15e   : > { %s3065_s15 = scalar_lea.vmem %s3064_s22, 2048 }
 0x161   : > { %1249 = vperm.xlu1 %3029, %v426_v41  }
 0x18b   : > { %v710_v42 = vpop.permute.xlu1 %709 }
 0x18c   : > { %v714_v44 = vpop.permute.xlu0 %713 }
 0x18d   : > { %v718_v50 = vsel %vm717_vm2, %v710_v42, %v714_v44  ;;  %v720_v51 = vsel %vm717_vm2, %v714_v44, %v710_v42  ;;  %v1051_v44 = vld [vmem:[#allocation2 + $0xd8] sm:$0xff] }
 0x18e   : > { %v735_v56 = vmul.f32 %v728_v48, %v720_v51  ;;  %v736_v57 = vmul.f32 %v732_v49, %v718_v50 }
 0x18f   : > { %v712_v46 = vpop.permute.xlu1 %711 }
 0x190   : > { %v650_v47 = vpop.permute.xlu0 %649 }
 0x193   : > { %v716_v52 = vpop.permute.xlu1 %715 }
 0x194   : > { %v719_v53 = vsel %vm717_vm2, %v712_v46, %v716_v52  ;;  %v721_v54 = vsel %vm717_vm2, %v716_v52, %v712_v46  ;;  %v654_v55 = vpop.permute.xlu0 %653  ;;  %v1140_v46 = vld [vmem:[#allocation2 + $0xf0] sm:$0xff]  ;;  %vm824_vm2 = vcmp.lt.s32.totalorder %v3348_v43, 112  ;;  %v1783_v43 = vld [vmem:[#allocation2 + $0x38] sm:$0xff] }
 0x195   : > { %v737_v58 = vmul.f32 %v728_v48, %v721_v54  ;;  %v738_v59 = vmul.f32 %v732_v49, %v719_v53  ;;  %v658_v3 = vsel %vm657_vm3, %v650_v47, %v654_v55  ;;  %v660_v13 = vsel %vm657_vm3, %v654_v55, %v650_v47  ;;  %v1141_v49 = vld [vmem:[#allocation2 + $0xf8] sm:$0xff] }
 0x196   : > { %v676_v7 = vmul.f32 %v672_v1, %v658_v3  ;;  %v675_v21 = vmul.f32 %v668_v10, %v660_v13  ;;  %v421_v3 = vld [vmem:[%s419_s16] sm:$0xf]  ;;  %s2767_s16 = sshll.u32 %s407_s13, 6 }
 0x197   : > { %v3359_v61 = vpack.c.bf16 %v737_v58, %v735_v56  ;;  %v652_v62 = vpop.permute.xlu1 %651  ;;  %v3362_v63 = vpack.c.bf16 %v738_v59, %v736_v57  ;;  %s3589_s25 = scalar_lea.vmem [#allocation5], %s2767_s16 }
 0x198   : > { %v619_v2 = vpop.permute.xlu0 %618  ;;  %s2675_s24 = sshll.u32 %s3589_s25, 4  ;;  %s3720_s24 = int_to_ptr.vmem [resolvable:$true] %s2675_s24 }
 0x199   : > { %2838 = vmatprep.subr.bf16.mxu1 %v3362_v63  ;;  %s3059_s21 = scalar_lea.vmem %s3720_s24, 1024  ;;  %p3066_p2 = scmp.lt.s32.totalorder %s3720_s24, %s3064_s22 }
 0x19a   : > { %2840 = vmatpush1.bf16.msra.mxu1 %v3359_v61  ;;  %p3060_p6 = scmp.ne.s32.totalorder %s3720_s24, %s3059_s21  ;;  %p3067_p3 = scmp.lt.s32.totalorder %s3065_s15, %s3059_s21 }
 0x19b   : > { %2842 = vmatprep.subr.bf16.mxu1 %v3326_v35  ;;  %v656_v5 = vpop.permute.xlu1 %655 }
 0x19c   : > { %v659_v6 = vsel %vm657_vm3, %v652_v62, %v656_v5  ;;  %v661_v8 = vsel %vm657_vm3, %v656_v5, %v652_v62  ;;  %v623_v14 = vpop.permute.xlu0 %622  ;;  %v2786_v5 = vld [vmem:[%s3775_s2 + $0x10] sm:$0x3]  ;;  %p3061_p10 = pnand %p3060_p6, %p3797_p9  ;;  %p3068_p4 = por %p3067_p3, %p3066_p2 }
 0x19d   : > { %v678_v9 = vmul.f32 %v672_v1, %v659_v6  ;;  %2787 = vmatmul.mubr.msk.f32.vlgmr.msra.gmra.mrb[2].mxu1 %vm882_vm4, %v880_v4  ;;  %v677_v19 = vmul.f32 %v668_v10, %v661_v8  ;;  %v629_v22 = vsel %vm628_vm5, %v619_v2, %v623_v14  ;;  %v631_v32 = vsel %vm628_vm5, %v623_v14, %v619_v2 }
 0x19e   : > { %2844 = vmatpush1.bf16.msra.mxu1 %v3324_v34  ;;  %959 = vmatprep.mubr.f32.mxu1 %v3130_v0  ;;  %v646_v27 = vmul.f32 %v642_v20, %v629_v22  ;;  %v645_v37 = vmul.f32 %v638_v30, %v631_v32  ;;  %v422_v6 = vunpack.c.0.s8 %v421_v3  ;;  %v865_v11 = vrot.slane %v2786_v5, %v3314_v15  ;;  %p3062_p12 = pneg %p3061_p10 }
 0x19f   : > { %v621_v16 = vpop.permute.xlu1 %620  ;;  %v3384_v18 = vpack.c.bf16 %v678_v9, %v676_v7  ;;  %v3392_v25 = vpack.c.bf16 %v677_v19, %v675_v21  ;;  %v423_v7 = vunpack.c.1.s8 %v421_v3 }
 0x1a0   : > { %vm1326_vm7 = vcmp.eq.s32.totalorder %v422_v6, 0  ;;  %vm1767_vm9 = vcmp.eq.s32.totalorder %v422_v6, 1  ;;  %vm2209_vm11 = vcmp.eq.s32.totalorder %v422_v6, 2  ;;  %vm2650_vm13 = vcmp.eq.s32.totalorder %v422_v6, 3  ;;  %v2783_v6 = vld [vmem:[%s3775_s2 + $0xa] sm:$0x3]  ;;  %p3069_p7 = pnand %p3068_p4, %p3062_p12 }
 0x1a1   : > { %2788 = vmatmul.mubr.msk.f32.gmra.mrb[4].mxu1 %vm882_vm4, %v881_v12  ;;  %2846 = vmatprep.subr.bf16.mxu1 %v3384_v18  ;;  %v869_v12 = vrot.slane %v2786_v5, %v3316_v17  ;;  %vm1327_vm8 = vcmp.eq.s32.totalorder %v423_v7, 0  ;;  %vm1768_vm10 = vcmp.eq.s32.totalorder %v423_v7, 1  ;;  %vm2210_vm12 = vcmp.eq.s32.totalorder %v423_v7, 2 }
 0x1a2   : > { %1036 = vmatprep.mubr.f32.mxu1 %v3130_v0  ;;  %vm2651_vm14 = vcmp.eq.s32.totalorder %v423_v7, 3 }
 0x1a3   : > { %v625_v24 = vpop.permute.xlu1 %624 }
 0x1a4   : > { %v630_v26 = vsel %vm628_vm5, %v621_v16, %v625_v24  ;;  %v632_v28 = vsel %vm628_vm5, %v625_v24, %v621_v16 }
 0x1a5   : > { %v648_v29 = vmul.f32 %v642_v20, %v630_v26  ;;  %2789 = vmatmul.mubr.msk.f32.vlgmr.msra.gmra.mrb[2].mxu1 %vm882_vm4, %v877_v23  ;;  %v647_v36 = vmul.f32 %v638_v30, %v632_v28 }
 0x1a6   : > { %2848 = vmatpush1.bf16.msra.mxu1 %v3392_v25  ;;  %1042 = vmatprep.mubr.f32.mxu1 %v3130_v0 }
 0x1a7   : > { %v2849_v33 = vpack.c.bf16 %v648_v29, %v646_v27  ;;  %v2851_v41 = vpack.c.bf16 %v647_v36, %v645_v37 }
 0x1a9   : > { %2790 = vmatmul.mubr.msk.f32.gmra.mrb[4].mxu1 %vm882_vm4, %v878_v31  ;;  %2850 = vmatprep.subr.bf16.mxu1 %v2849_v33 }
 0x1aa   : > { %1122 = vmatprep.mubr.f32.mxu1 %v3130_v0 }
 0x1ad   : > { %v3406_v42 = vpop.permute.xlu0 %1231  ;;  %2791 = vmatmul.mubr.msk.f32.vlgmr.msra.gmra.mrb[2].mxu1 %vm882_vm4, %v1050_v38 }
 0x1ae   : > { %2852 = vmatpush1.bf16.msra.mxu1 %v2851_v41  ;;  %1128 = vmatprep.mubr.f32.mxu1 %v3130_v0 }
 0x1b1   : > { %v3410_v45 = vpop.permute.xlu0 %756  ;;  %2792 = vmatmul.mubr.msk.f32.gmra.mrb[4].mxu1 %vm882_vm4, %v1051_v44 }
 0x1b2   : > { %1212 = vmatprep.mubr.f32.mxu1 %v3130_v0 }
 0x1b4   : > { %v3414_v47 = vpop.permute.xlu1 %1236 }
 0x1b5   : > { %v3416_v48 = vpop.permute.xlu0 %760  ;;  %2793 = vmatmul.mubr.msk.f32.vlgmr.msra.gmra.mrb[2].mxu1 %vm882_vm4, %v1140_v46 }
 0x1b6   : > { %1218 = vmatprep.mubr.f32.mxu1 %v3130_v0 }
 0x1b8   : > { %v3420_v50 = vpop.permute.xlu1 %758 }
 0x1b9   : > { %v3422_v51 = vpop.permute.xlu0 %679  ;;  %2794 = vmatmul.mubr.msk.f32.gmra.mrb[4].mxu1 %vm882_vm4, %v1141_v49 }
 0x1ba   : > { %1760 = vmatprep.mubr.f32.mxu1 %v3130_v0 }
 0x1bc   : > { %v3426_v52 = vpop.permute.xlu1 %762 }
 0x1bd   : > { %v3428_v53 = vpop.permute.xlu0 %683 }
 0x1c0   : > { %v3430_v54 = vpop.permute.xlu1 %681 }
 0x1c1   : > { %v3432_v55 = vpop.permute.xlu0 %786 }
 0x1c4   : > { %v3434_v56 = vpop.permute.xlu1 %685 }
 0x1c5   : > { %v3436_v57 = vpop.permute.xlu0 %790 }
 0x1c8   : > { %v3438_v58 = vpop.permute.xlu1 %788 }
 0x1c9   : > { %v3440_v59 = vpop.permute.xlu0 %816 }
 0x1cc   : > { %v3443_v60 = vpop.permute.xlu1 %792 }
 0x1cd   : > { %v3445_v62 = vpop.permute.xlu0 %820 }
 0x1d0   : > { %v3450_v1 = vpop.permute.xlu1 %818 }
 0x1d1   : > { %v847_v2 = vpop.permute.xlu0 %846 }
 0x1d4   : > { %v3453_v4 = vpop.permute.xlu1 %822 }
 0x1d5   : > { %v851_v8 = vpop.permute.xlu0 %850 }
 0x1d6   : > { %v855_v9 = vsel %vm854_vm6, %v847_v2, %v851_v8  ;;  %v857_v10 = vsel %vm854_vm6, %v851_v8, %v847_v2 }
 0x1d7   : > { %v3466_v20 = vmul.f32 %v865_v11, %v855_v9  ;;  %v3468_v21 = vmul.f32 %v869_v12, %v857_v10 }
 0x1d8   : > { %v849_v13 = vpop.permute.xlu1 %848 }
 0x1d9   : > { %v542_v14 = vpop.permute.xlu0 %541 }
 0x1da   : > { %v614_v16 = vadd.f32 %v3340_v39, %v542_v14  ;;  %v616_v19 = vadd.f32 %v3342_v40, %v542_v14 }
 0x1dc   : > { %v853_v22 = vpop.permute.xlu1 %852  ;;  %v3470_v23 = vsel %vm1326_vm7, %v614_v16, 0.0  ;;  %v3472_v24 = vsel %vm1327_vm8, %v616_v19, 0.0  ;;  %v3474_v26 = vsel %vm1767_vm9, %v614_v16, 0.0  ;;  %v3476_v27 = vsel %vm1768_vm10, %v616_v19, 0.0 }
 0x1dd   : > { %v856_v39 = vsel %vm854_vm6, %v849_v13, %v853_v22  ;;  %v858_v40 = vsel %vm854_vm6, %v853_v22, %v849_v13  ;;  %v3482_v28 = vsel %vm2209_vm11, %v614_v16, 0.0  ;;  %v3484_v29 = vsel %vm2210_vm12, %v616_v19, 0.0 }
 0x1de   : > { %v3486_v30 = vmul.f32 %v865_v11, %v856_v39  ;;  %v3488_v31 = vmul.f32 %v869_v12, %v858_v40  ;;  %v3490_v32 = vsel %vm2650_vm13, %v614_v16, 0.0  ;;  %v3492_v33 = vsel %vm2651_vm14, %v616_v19, 0.0  ;;  %v2780_v19 = vld [vmem:[%s3775_s2 + $0x4] sm:$0x3] }
 0x1df   : > { %v768_v11 = vsel %vm764_vm15, %v3426_v52, %v3420_v50  ;;  %v779_v13 = vrot.slane %v2783_v6, %v3316_v17  ;;  %v767_v16 = vsel %vm764_vm15, %v3416_v48, %v3410_v45  ;;  %v766_v22 = vsel %vm764_vm15, %v3420_v50, %v3426_v52 }
 0x1e0   : > { %v2903_v36 = vpack.c.bf16 %v3486_v30, %v3466_v20  ;;  %v2901_v37 = vpack.c.bf16 %v3488_v31, %v3468_v21  ;;  %v775_v40 = vrot.slane %v2783_v6, %v3314_v15  ;;  %v765_v50 = vsel %vm764_vm15, %v3410_v45, %v3416_v48  ;;  %v1340_v45 = vld [vmem:[#allocation2 + $0x60] sm:$0xff]  ;;  %v2221_v21 = vld [vmem:[#allocation2 + $0x8] sm:$0xff] }
 0x1e1   : > { %v785_v39 = vmul.f32 %v779_v13, %v768_v11  ;;  %v783_v52 = vmul.f32 %v779_v13, %v767_v16  ;;  %v690_v11 = vsel %vm687_vm0, %v3428_v53, %v3422_v51  ;;  %v1599_v16 = vld [vmem:[#allocation2 + $0xe0] sm:$0xff]  ;;  %v2393_v30 = vld [vmem:[#allocation2 + $0x88] sm:$0xff] }
 0x1e2   : > { %v2392_v20 = vld [vmem:[#allocation2 + $0x80] sm:$0xff] }
 0x1e3   : > { %v2482_v31 = vld [vmem:[#allocation2 + $0xa0] sm:$0xff] }
 0x288   : > { %v1214_v38 = vpop.f32.mrb[2].mxu1 }
 0x289   : > { %v1216_v41 = vpop.f32.mrb[3].mxu1  ;;  %v1239_v44 = vadd.f32 %v3406_v42, %v1214_v38  ;;  %v689_v38 = vsel %vm687_vm0, %v3430_v54, %v3434_v56 }
 0x28a   : > { %v1240_v46 = vadd.f32 %v3406_v42, %v1216_v41  ;;  %v3531_v41 = vld [vmem:[%s3780_s7] sm:$0xff] }
 0x28b   : > { %v1243_v7 = vmax.f32 %v1239_v44, 0.0  ;;  %v702_v44 = vrot.slane %v2780_v19, %v3316_v17 }
 0x28c   : > { %v1220_v49 = vpop.f32.mrb[4].mxu1  ;;  %v1244_v9 = vmax.f32 %v1240_v46, 0.0  ;;  %v784_v46 = vmul.f32 %v775_v40, %v766_v22 }
 0x28d   : > { %v1241_v2 = vadd.f32 %v3414_v47, %v1220_v49  ;;  %v1222_v3 = vpop.f32.mrb[5].mxu1  ;;  %v688_v49 = vsel %vm687_vm0, %v3422_v51, %v3428_v53  ;;  %v1509_v51 = vld [vmem:[#allocation2 + $0xc0] sm:$0xff]  ;;  %v1510_v53 = vld [vmem:[#allocation2 + $0xc8] sm:$0xff] }
 0x28e   : > { %v1242_v5 = vadd.f32 %v3414_v47, %v1222_v3  ;;  %v3545_v3 = vpack.c.bf16 %v785_v39, %v783_v52  ;;  %v706_v48 = vmul.f32 %v702_v44, %v688_v49 }
 0x28f   : > { %v1245_v8 = vmax.f32 %v1241_v2, 0.0  ;;  %v708_v2 = vmul.f32 %v702_v44, %v689_v38 }
 0x290   : > { %v1246_v10 = vmax.f32 %v1242_v5, 0.0  ;;  %v782_v5 = vmul.f32 %v775_v40, %v765_v50 }
 0x291   : > { %v2855_v12 = vpack.c.bf16 %v1245_v8, %v1243_v7  ;;  %v691_v7 = vsel %vm687_vm0, %v3434_v56, %v3430_v54  ;;  %v2865_v8 = vpack.c.bf16 %v708_v2, %v706_v48  ;;  %v1337_v56 = vld [vmem:[#allocation2 + $0x40] sm:$0xff]  ;;  %v2784_v2 = vld [vmem:[%s3775_s2 + $0xc] sm:$0x3] }
 0x292   : > { %v2853_v14 = vpack.c.bf16 %v1246_v10, %v1244_v9  ;;  %v3550_v6 = vpack.c.bf16 %v784_v46, %v782_v5  ;;  %v698_v9 = vrot.slane %v2780_v19, %v3314_v15  ;;  %v1341_v10 = vld [vmem:[#allocation2 + $0x68] sm:$0xff]  ;;  %v3581_v19 = vpop.permute.xlu1 %1249 }
 0x294   : > { %2854 = vmatprep.subr.bf16.mxu0 %v2853_v14  ;;  %v705_v54 = vmul.f32 %v698_v9, %v690_v11  ;;  %v1338_v14 = vld [vmem:[#allocation2 + $0x48] sm:$0xff] }
 0x295   : > { %2856 = vmatpush1.bf16.msra.mxu0 %v2855_v12  ;;  %v707_v12 = vmul.f32 %v698_v9, %v691_v7  ;;  %v2785_v11 = vld [vmem:[%s3775_s2 + $0xe] sm:$0x3] }
 0x296   : > { %2858 = vmatprep.subr.bf16.mxu0 %v3326_v35 }
 0x297   : > { %v2867_v13 = vpack.c.bf16 %v707_v12, %v705_v54 }
 0x298   : > { %2795 = vmatmul.mubr.msk.f32.vlgmr.msra.gmra.mrb[4].mxu0 %vm882_vm4, %v3531_v41 }
 0x299   : > { %2860 = vmatpush1.bf16.msra.mxu0 %v3324_v34  ;;  %1412 = vmatprep.mubr.f32.mxu0 %v3130_v0 }
 0x29a   : > { %2862 = vmatprep.subr.bf16.mxu0 %v3545_v3 }
 0x29c   : > { %2796 = vmatmul.mubr.msk.f32.vlgmr.msra.gmra.mrb[6].mxu0 %vm882_vm4, %v1340_v45  ;;  %v798_v45 = vsel %vm794_vm1, %v3443_v60, %v3438_v58 }
 0x29d   : > { %2864 = vmatpush1.bf16.msra.mxu0 %v3550_v6  ;;  %1418 = vmatprep.mubr.f32.mxu0 %v3130_v0 }
 0x29e   : > { %2866 = vmatprep.subr.bf16.mxu0 %v2865_v8  ;;  %v809_v8 = vrot.slane %v2784_v2, %v3316_v17 }
 0x2a0   : > { %2797 = vmatmul.mubr.msk.f32.gmra.mrb[8].mxu0 %vm882_vm4, %v1341_v10  ;;  %v797_v10 = vsel %vm794_vm1, %v3436_v57, %v3432_v55 }
 0x2a1   : > { %1495 = vmatprep.mubr.f32.mxu0 %v3130_v0 }
 0x2a4   : > { %2798 = vmatmul.mubr.msk.f32.vlgmr.msra.gmra.mrb[6].mxu0 %vm882_vm4, %v1337_v56  ;;  %v796_v56 = vsel %vm794_vm1, %v3438_v58, %v3443_v60 }
 0x2a5   : > { %2868 = vmatpush1.bf16.msra.mxu0 %v2867_v13  ;;  %1501 = vmatprep.mubr.f32.mxu0 %v3130_v0  ;;  %v815_v13 = vmul.f32 %v809_v8, %v798_v45 }
 0x2a6   : > { %2870 = vmatprep.subr.bf16.mxu0 %v3384_v18  ;;  %v1600_v18 = vld [vmem:[#allocation2 + $0xe8] sm:$0xff] }
 0x2a8   : > { %2799 = vmatmul.mubr.msk.f32.gmra.mrb[8].mxu0 %vm882_vm4, %v1338_v14 }
 0x2a9   : > { %1581 = vmatprep.mubr.f32.mxu0 %v3130_v0 }
 0x2ac   : > { %2800 = vmatmul.mubr.msk.f32.vlgmr.msra.gmra.mrb[6].mxu0 %vm882_vm4, %v1509_v51 }
 0x2ad   : > { %2872 = vmatpush1.bf16.msra.mxu0 %v3392_v25  ;;  %1587 = vmatprep.mubr.f32.mxu0 %v3130_v0 }
 0x2b0   : > { %2801 = vmatmul.mubr.msk.f32.gmra.mrb[8].mxu0 %vm882_vm4, %v1510_v53  ;;  %v805_v53 = vrot.slane %v2784_v2, %v3314_v15  ;;  %v1782_v2 = vld [vmem:[#allocation2 + $0x30] sm:$0xff] }
 0x2b1   : > { %1671 = vmatprep.mubr.f32.mxu0 %v3130_v0 }
 0x2b2   : > { %v814_v60 = vmul.f32 %v805_v53, %v796_v56 }
 0x2b4   : > { %2802 = vmatmul.mubr.msk.f32.vlgmr.msra.gmra.mrb[6].mxu0 %vm882_vm4, %v1599_v16  ;;  %v828_v16 = vsel %vm824_vm2, %v3453_v4, %v3450_v1 }
 0x2b5   : > { %1677 = vmatprep.mubr.f32.mxu0 %v3130_v0 }
 0x2b8   : > { %2803 = vmatmul.mubr.msk.f32.gmra.mrb[8].mxu0 %vm882_vm4, %v1600_v18 }
 0x2b9   : > { %2202 = vmatprep.mubr.f32.mxu0 %v3130_v0 }
 0x36b   : > { %v1321_v25 = vpop.f32.mrb[4].mxu0 }
 0x36c   : > { %v1322_v22 = vadd.f32 %v1321_v25, %v3581_v19  ;;  %v1323_v39 = vpop.f32.mrb[5].mxu0  ;;  %v795_v25 = vsel %vm794_vm1, %v3432_v55, %v3436_v57  ;;  %v835_v55 = vrot.slane %v2785_v11, %v3314_v15 }
 0x36d   : > { %v1324_v40 = vadd.f32 %v1323_v39, %v3581_v19  ;;  %v839_v39 = vrot.slane %v2785_v11, %v3316_v17  ;;  %v825_v17 = vsel %vm824_vm2, %v3440_v59, %v3445_v62 }
 0x36e   : > { %v1330_v38 = vadd.f32 %v3470_v23, %v1322_v22  ;;  %v813_v22 = vmul.f32 %v809_v8, %v797_v10 }
 0x36f   : > { %v1331_v50 = vadd.f32 %v3472_v24, %v1324_v40  ;;  %v827_v40 = vsel %vm824_vm2, %v3445_v62, %v3440_v59  ;;  %v1779_v59 = vld [vmem:[#allocation2 + $0x10] sm:$0xff]  ;;  %v1780_v62 = vld [vmem:[#allocation2 + $0x18] sm:$0xff] }
 0x370   : > { %v1332_v52 = vmax.f32 %v1330_v38, 0.0  ;;  %v826_v38 = vsel %vm824_vm2, %v3450_v1, %v3453_v4  ;;  %v843_v57 = vmul.f32 %v839_v39, %v827_v40  ;;  %v842_v4 = vmul.f32 %v835_v55, %v825_v17  ;;  %v2220_v40 = vld [vmem:[#allocation2] sm:$0xff] }
 0x371   : > { %v1333_v44 = vmax.f32 %v1331_v50, 0.0  ;;  %v845_v50 = vmul.f32 %v839_v39, %v828_v16 }
 0x372   : > { %1334 = vst [vmem:[%s3589_s25] sm:$0xff] %v1332_v52  ;;  %v2877_v52 = vpack.c.bf16 %v815_v13, %v813_v22 }
 0x373   : > { %1335 = vst [vmem:[%s3589_s25 + $0x8] sm:$0xff] %v1333_v44  ;;  %v812_v44 = vmul.f32 %v805_v53, %v795_v25  ;;  %v2881_v1 = vpack.c.bf16 %v845_v50, %v843_v57 }
 0x387   : > { %v1673_v46 = vpop.f32.mrb[6].mxu0 }
 0x388   : > { %v1675_v49 = vpop.f32.mrb[7].mxu0  ;;  %v1688_v5 = vadd.f32 %v1673_v46, %v3406_v42  ;;  %v2879_v46 = vpack.c.bf16 %v814_v60, %v812_v44  ;;  %v2224_v60 = vld [vmem:[#allocation2 + $0x28] sm:$0xff] }
 0x389   : > { %v1689_v23 = vadd.f32 %v1675_v49, %v3406_v42  ;;  %v844_v49 = vmul.f32 %v835_v55, %v826_v38 }
 0x38a   : > { %v1692_v12 = vmax.f32 %v1688_v5, 0.0  ;;  %v1951_v5 = vld [vmem:[#allocation2 + $0x90] sm:$0xff] }
 0x38b   : > { %v1679_v24 = vpop.f32.mrb[8].mxu0  ;;  %v1693_v14 = vmax.f32 %v1689_v23, 0.0  ;;  %v2883_v15 = vpack.c.bf16 %v844_v49, %v842_v4  ;;  %v1952_v23 = vld [vmem:[#allocation2 + $0x98] sm:$0xff] }
 0x38c   : > { %v1690_v48 = vadd.f32 %v1679_v24, %v3414_v47  ;;  %v1681_v7 = vpop.f32.mrb[9].mxu0  ;;  %v2041_v24 = vld [vmem:[#allocation2 + $0xb0] sm:$0xff] }
 0x38d   : > { %v1691_v9 = vadd.f32 %v1681_v7, %v3414_v47 }
 0x38e   : > { %v1694_v54 = vmax.f32 %v1690_v48, 0.0 }
 0x38f   : > { %v1695_v51 = vmax.f32 %v1691_v9, 0.0 }
 0x390   : > { %v2875_v18 = vpack.c.bf16 %v1694_v54, %v1692_v12 }
 0x391   : > { %v2873_v58 = vpack.c.bf16 %v1695_v51, %v1693_v14 }
 0x393   : > { %2874 = vmatprep.subr.bf16.mxu1 %v2873_v58  ;;  %v2223_v58 = vld [vmem:[#allocation2 + $0x20] sm:$0xff] }
 0x394   : > { %2876 = vmatpush1.bf16.msra.mxu1 %v2875_v18 }
 0x395   : > { %2878 = vmatprep.subr.bf16.mxu1 %v2877_v52 }
 0x397   : > { %2804 = vmatmul.mubr.msk.f32.vlgmr.msra.gmra.mrb[6].mxu1 %vm882_vm4, %v3531_v41 }
 0x398   : > { %2880 = vmatpush1.bf16.msra.mxu1 %v2879_v46  ;;  %1854 = vmatprep.mubr.f32.mxu1 %v3130_v0 }
 0x399   : > { %2882 = vmatprep.subr.bf16.mxu1 %v2881_v1 }
 0x39b   : > { %2807 = vmatmul.mubr.msk.f32.vlgmr.msra.gmra.mrb[8].mxu1 %vm882_vm4, %v1782_v2 }
 0x39c   : > { %2884 = vmatpush1.bf16.msra.mxu1 %v2883_v15  ;;  %1860 = vmatprep.mubr.f32.mxu1 %v3130_v0 }
 0x39d   : > { %2886 = vmatprep.subr.bf16.mxu1 %v3326_v35 }
 0x39f   : > { %2808 = vmatmul.mubr.msk.f32.gmra.mrb[10].mxu1 %vm882_vm4, %v1783_v43 }
 0x3a0   : > { %1937 = vmatprep.mubr.f32.mxu1 %v3130_v0 }
 0x3a3   : > { %2809 = vmatmul.mubr.msk.f32.vlgmr.msra.gmra.mrb[8].mxu1 %vm882_vm4, %v1779_v59 }
 0x3a4   : > { %2888 = vmatpush1.bf16.msra.mxu1 %v3324_v34  ;;  %1943 = vmatprep.mubr.f32.mxu1 %v3130_v0 }
 0x3a5   : > { %2890 = vmatprep.subr.bf16.mxu1 %v3362_v63  ;;  %v2042_v63 = vld [vmem:[#allocation2 + $0xb8] sm:$0xff] }
 0x3a7   : > { %2810 = vmatmul.mubr.msk.f32.gmra.mrb[10].mxu1 %vm882_vm4, %v1780_v62 }
 0x3a8   : > { %2023 = vmatprep.mubr.f32.mxu1 %v3130_v0 }
 0x3ab   : > { %2811 = vmatmul.mubr.msk.f32.vlgmr.msra.gmra.mrb[8].mxu1 %vm882_vm4, %v1951_v5 }
 0x3ac   : > { %2892 = vmatpush1.bf16.msra.mxu1 %v3359_v61  ;;  %2029 = vmatprep.mubr.f32.mxu1 %v3130_v0 }
 0x3af   : > { %2812 = vmatmul.mubr.msk.f32.gmra.mrb[10].mxu1 %vm882_vm4, %v1952_v23 }
 0x3b0   : > { %2113 = vmatprep.mubr.f32.mxu1 %v3130_v0 }
 0x3b3   : > { %2813 = vmatmul.mubr.msk.f32.vlgmr.msra.gmra.mrb[8].mxu1 %vm882_vm4, %v2041_v24 }
 0x3b4   : > { %2119 = vmatprep.mubr.f32.mxu1 %v3130_v0 }
 0x3b7   : > { %2814 = vmatmul.mubr.msk.f32.gmra.mrb[10].mxu1 %vm882_vm4, %v2042_v63 }
 0x3b8   : > { %2643 = vmatprep.mubr.f32.mxu1 %v3130_v0 }
 0x46a   : > { %v1762_v61 = vpop.f32.mrb[6].mxu1 }
 0x46b   : > { %v1763_v45 = vadd.f32 %v1762_v61, %v3581_v19  ;;  %v1764_v48 = vpop.f32.mrb[7].mxu1 }
 0x46c   : > { %v1765_v7 = vadd.f32 %v1764_v48, %v3581_v19 }
 0x46d   : > { %v1771_v8 = vadd.f32 %v3474_v26, %v1763_v45 }
 0x46e   : > { %v1772_v9 = vadd.f32 %v3476_v27, %v1765_v7 }
 0x46f   : > { %v1773_v10 = vmax.f32 %v1771_v8, 0.0 }
 0x470   : > { %v1774_v11 = vmax.f32 %v1772_v9, 0.0 }
 0x471   : > { %2805 = vst [vmem:[%s3589_s25 + $0x10] sm:$0xff] %v1773_v10 }
 0x472   : > { %2806 = vst [vmem:[%s3589_s25 + $0x18] sm:$0xff] %v1774_v11 }
 0x486   : > { %v2115_v12 = vpop.f32.mrb[8].mxu1 }
 0x487   : > { %v2117_v54 = vpop.f32.mrb[9].mxu1  ;;  %v2130_v56 = vadd.f32 %v2115_v12, %v3406_v42 }
 0x488   : > { %v2131_v13 = vadd.f32 %v2117_v54, %v3406_v42 }
 0x489   : > { %v2134_v18 = vmax.f32 %v2130_v56, 0.0 }
 0x48a   : > { %v2121_v14 = vpop.f32.mrb[10].mxu1  ;;  %v2135_v25 = vmax.f32 %v2131_v13, 0.0 }
 0x48b   : > { %v2132_v51 = vadd.f32 %v2121_v14, %v3414_v47  ;;  %v2123_v53 = vpop.f32.mrb[11].mxu1 }
 0x48c   : > { %v2133_v16 = vadd.f32 %v2123_v53, %v3414_v47 }
 0x48d   : > { %v2136_v26 = vmax.f32 %v2132_v51, 0.0 }
 0x48e   : > { %v2137_v27 = vmax.f32 %v2133_v16, 0.0 }
 0x48f   : > { %v2895_v22 = vpack.c.bf16 %v2136_v26, %v2134_v18 }
 0x490   : > { %v2893_v39 = vpack.c.bf16 %v2137_v27, %v2135_v25 }
 0x492   : > { %2894 = vmatprep.subr.bf16.mxu0 %v2893_v39 }
 0x493   : > { %2896 = vmatpush1.bf16.msra.mxu0 %v2895_v22 }
 0x494   : > { %2898 = vmatprep.subr.bf16.mxu0 %v2881_v1 }
 0x496   : > { %2815 = vmatmul.mubr.msk.f32.vlgmr.msra.gmra.mrb[10].mxu0 %vm882_vm4, %v3531_v41 }
 0x497   : > { %2900 = vmatpush1.bf16.msra.mxu0 %v2883_v15  ;;  %2295 = vmatprep.mubr.f32.mxu0 %v3130_v0 }
 0x498   : > { %2902 = vmatprep.subr.bf16.mxu0 %v2901_v37 }
 0x49a   : > { %2818 = vmatmul.mubr.msk.f32.vlgmr.msra.gmra.mrb[12].mxu0 %vm882_vm4, %v2223_v58 }
 0x49b   : > { %2904 = vmatpush1.bf16.msra.mxu0 %v2903_v36  ;;  %2301 = vmatprep.mubr.f32.mxu0 %v3130_v0 }
 0x49c   : > { %2906 = vmatprep.subr.bf16.mxu0 %v3545_v3 }
 0x49e   : > { %2819 = vmatmul.mubr.msk.f32.gmra.mrb[14].mxu0 %vm882_vm4, %v2224_v60 }
 0x49f   : > { %2378 = vmatprep.mubr.f32.mxu0 %v3130_v0 }
 0x4a2   : > { %2820 = vmatmul.mubr.msk.f32.vlgmr.msra.gmra.mrb[12].mxu0 %vm882_vm4, %v2220_v40 }
 0x4a3   : > { %2908 = vmatpush1.bf16.msra.mxu0 %v3550_v6  ;;  %2384 = vmatprep.mubr.f32.mxu0 %v3130_v0 }
 0x4a4   : > { %2910 = vmatprep.subr.bf16.mxu0 %v3326_v35  ;;  %v2483_v35 = vld [vmem:[#allocation2 + $0xa8] sm:$0xff] }
 0x4a6   : > { %2821 = vmatmul.mubr.msk.f32.gmra.mrb[14].mxu0 %vm882_vm4, %v2221_v21 }
 0x4a7   : > { %2464 = vmatprep.mubr.f32.mxu0 %v3130_v0 }
 0x4aa   : > { %2822 = vmatmul.mubr.msk.f32.vlgmr.msra.gmra.mrb[12].mxu0 %vm882_vm4, %v2392_v20 }
 0x4ab   : > { %2912 = vmatpush1.bf16.msra.mxu0 %v3324_v34  ;;  %2470 = vmatprep.mubr.f32.mxu0 %v3130_v0 }
 0x4ae   : > { %2823 = vmatmul.mubr.msk.f32.gmra.mrb[14].mxu0 %vm882_vm4, %v2393_v30 }
 0x4af   : > { %2554 = vmatprep.mubr.f32.mxu0 %v3130_v0 }
 0x4b2   : > { %2824 = vmatmul.mubr.msk.f32.vlgmr.msra.gmra.mrb[12].mxu0 %vm882_vm4, %v2482_v31 }
 0x4b3   : > { %2560 = vmatprep.mubr.f32.mxu0 %v3130_v0 }
 0x4b6   : > { %2825 = vmatmul.mubr.msk.f32.gmra.mrb[14].mxu0 %vm882_vm4, %v2483_v35 }
 0x569   : > { %v2204_v36 = vpop.f32.mrb[10].mxu0 }
 0x56a   : > { %v2205_v34 = vadd.f32 %v2204_v36, %v3581_v19  ;;  %v2206_v37 = vpop.f32.mrb[11].mxu0 }
 0x56b   : > { %v2207_v3 = vadd.f32 %v2206_v37, %v3581_v19 }
 0x56c   : > { %v2213_v6 = vadd.f32 %v3482_v28, %v2205_v34 }
 0x56d   : > { %v2214_v38 = vadd.f32 %v3484_v29, %v2207_v3 }
 0x56e   : > { %v2215_v50 = vmax.f32 %v2213_v6, 0.0 }
 0x56f   : > { %v2216_v52 = vmax.f32 %v2214_v38, 0.0 }
 0x570   : > { %2816 = vst [vmem:[%s3589_s25 + $0x20] sm:$0xff] %v2215_v50 }
 0x571   : > { %2817 = vst [vmem:[%s3589_s25 + $0x28] sm:$0xff] %v2216_v52 }
 0x585   : > { %v2556_v44 = vpop.f32.mrb[12].mxu0 }
 0x586   : > { %v2558_v55 = vpop.f32.mrb[13].mxu0  ;;  %v2571_v0 = vadd.f32 %v2556_v44, %v3406_v42 }
 0x587   : > { %v2572_v17 = vadd.f32 %v2558_v55, %v3406_v42 }
 0x588   : > { %v2575_v28 = vmax.f32 %v2571_v0, 0.0 }
 0x589   : > { %v2562_v57 = vpop.f32.mrb[14].mxu0  ;;  %v2576_v4 = vmax.f32 %v2572_v17, 0.0 }
 0x58a   : > { %v2573_v46 = vadd.f32 %v2562_v57, %v3414_v47  ;;  %v2564_v49 = vpop.f32.mrb[15].mxu0 }
 0x58b   : > { %v2574_v1 = vadd.f32 %v2564_v49, %v3414_v47 }
 0x58c   : > { %v2577_v29 = vmax.f32 %v2573_v46, 0.0 }
 0x58d   : > { %v2578_v2 = vmax.f32 %v2574_v1, 0.0 }
 0x58e   : > { %v2915_v15 = vpack.c.bf16 %v2577_v29, %v2575_v28 }
 0x58f   : > { %v2913_v43 = vpack.c.bf16 %v2578_v2, %v2576_v4 }
 0x591   : > { %2914 = vmatprep.subr.bf16.mxu1 %v2913_v43 }
 0x592   : > { %2916 = vmatpush1.bf16.msra.mxu1 %v2915_v15 }
 0x595   : > { %2826 = vmatmul.mubr.msk.f32.vlgmr.msra.gmra.mrb[12].mxu1 %vm882_vm4, %v3531_v41 }
 0x668   : > { %v2645_v42 = vpop.f32.mrb[12].mxu1 }
 0x669   : > { %v2646_v59 = vadd.f32 %v2645_v42, %v3581_v19  ;;  %v2647_v47 = vpop.f32.mrb[13].mxu1 }
 0x66a   : > { %v2648_v62 = vadd.f32 %v2647_v47, %v3581_v19 }
 0x66b   : > { %v2654_v5 = vadd.f32 %v3490_v32, %v2646_v59 }
 0x66c   : > { %v2655_v23 = vadd.f32 %v3492_v33, %v2648_v62 }
 0x66d   : > { %v2656_v24 = vmax.f32 %v2654_v5, 0.0 }
 0x66e   : > { %v2657_v41 = vmax.f32 %v2655_v23, 0.0 }
 0x66f   : > { %2827 = vst [vmem:[%s3589_s25 + $0x30] sm:$0xff] %v2656_v24 }
 0x670   : > { %2828 = vst [vmem:[%s3589_s25 + $0x38] sm:$0xff] %v2657_v41 }
 0x671   : > { %3072 = shalt.err (!%p3069_p7)
}
 0x672   : > { %s3073_s13 = scalar_lea.hbm %s3725_s30, 1024  ;;  %s3077_s29 = scalar_lea.hbm %s3784_s11, 2048 }
 0x673   : > { %p3074_p8 = scmp.ne.s32.totalorder %s3725_s30, %s3073_s13  ;;  %p3078_p1 = scmp.lt.u32.totalorder %s3725_s30, %s3784_s11 }
 0x674   : > { %p3079_p0 = scmp.lt.u32.totalorder %s3077_s29, %s3073_s13  ;;  %p3081_p6 = scmp.lt.u32.totalorder %s3073_s13, %s3725_s30 }
 0x675   : > { %p3075_p11 = pnand %p3074_p8, %p3797_p9 }
 0x676   : > { %p3080_p5 = por %p3079_p0, %p3078_p1 }
 0x677   : > { %p3076_p13 = pneg %p3075_p11 }
 0x678   : > { %p3082_p10 = por %p3081_p6, %p3080_p5 }
 0x67a   : > { %p3083_p12 = pnand %p3082_p10, %p3076_p13 }
 0x67c   : > { %3086 = shalt.err (!%p3083_p12)
}
 0x67d   : > { %s3141_s15 = smov 256   ;;  %s3798_s21 = smov 16  }
 0x67e   : > { %2969 = dma.vmem_to_hbm [thread:$0]  (%p3797_p9), %s3720_s24, 1024, %s3725_s30, %s3731_s26, %s3141_s15, %s3141_s15, %s3798_s21  }
 0x67f PF: > { %p2981_p2 = scmp.ge.s32.totalorder %s3125_s20, 2  ;;  %s2690_s22 = sand.u32 1, %s3113_s17  }
 0x680   : > { %p3799_p3 = scmp.ne.s32.totalorder %s3791_s28, 0  ;;  %s2691_s13 = scalar_lea.sflag [#allocation4], %s2690_s22 }
 0x682   : > { %p2976_p4 = pnand %p2981_p2, %p3799_p3 }
 0x684   : > { %3108 = dma.done.wait (!%p2976_p4), %s2691_s13, 1024  }
 0x685   : > { %3110 = vsyncadd (!%p2976_p4), %s2691_s13, 4294966272  ;;  %s3800_s27 = sld [smem:[#allocation8_spill]]  ;;  %p22_p7 = scmp.ge.s32.totalorder %s3227_s23, 4  }
 0x686   : > { %s3801_s17 = smov %s3117_s18  ;;  %s3802_s18 = smov %s3121_s19 }
 0x687   : > { %s3804_s20 = smov %s3227_s23  ;;  %24 = sbr.rel (!%p22_p7) target bundleno = 4 (0x4), region = 133 }
 0x68b   : > { %s3803_s19 = smov %s3800_s27 }
 0x68e   :  { %2696 = vsyncpa [#allocation3], 1 }
 0x68f   :  { %2698 = vsyncpa [#allocation3 + $0x1], 1 }
 0x690   :  { %2699 = vsyncpa [#allocation4], 1 }
 0x691   :  { %2701 = vsyncpa [#allocation4 + $0x1], 1 }

</bundles_post_ra>
